<compile_context>
chip_gen: v5e
topology: v5e:2x2
jax: 0.10.0
libtpu: 0.0.40
codegen_flags: <defaults>
</compile_context>

<pallas_src>
import jax
import jax.numpy as jnp
from jax.experimental import pallas as pl
from jax.experimental.pallas import tpu as pltpu


# --------------------------------------------------------------------------- #
# Kernel
# --------------------------------------------------------------------------- #
def _resnet_block_kernel(x_ref, halo_ref,
                         w1_ref, s1_ref, t1_ref,
                         w2_ref, s2_ref, t2_ref,
                         o_ref):
    l = pl.program_id(1)
    n_l = pl.num_programs(1)
    tl = x_ref.shape[2]

    xt = x_ref[0]              # (C, TL) compute dtype; time on lanes
    halo = halo_ref[0, 0]      # (C, 4)  columns [a-2, a-1, b, b+1]

    w10, w11, w12 = w1_ref[0], w1_ref[1], w1_ref[2]
    w20, w21, w22 = w2_ref[0], w2_ref[1], w2_ref[2]

    def dotf(w, v):
        return jnp.dot(w, v, preferred_element_type=jnp.float32)

    def taps(w0, w1, w2, main, lo_c, hi_c):
        # out[:, t] = w0 @ src[:, t-1] + w1 @ src[:, t] + w2 @ src[:, t+1]
        # with src = [lo | main | hi]; lo_c = w0 @ lo and hi_c = w2 @ hi are the
        # precomputed boundary columns (f32, (C, 1)).  Three per-tap MXU dots
        # keep `main` at offset 0: no reflection-padded window, no 3C slab.
        y0 = dotf(w0, main)
        y1 = dotf(w1, main)
        y2 = dotf(w2, main)
        acc = (jnp.concatenate([lo_c, y0[:, :tl - 1]], axis=1)
               + y1
               + jnp.concatenate([y2[:, 1:], hi_c], axis=1))
        return acc, y0, y2

    def affine_relu(acc, s_ref, t_ref):
        return jnp.maximum(acc * s_ref[...] + t_ref[...], 0.0)

    # ---------------- Conv1 + BN1 + ReLU ---------------- #
    # Tiny halo products: z_k[:, j] = w1_k @ x[[a-2, a-1, b, b+1]][j].
    z0 = dotf(w10, halo)       # (C, 4)
    z1 = dotf(w11, halo)
    z2 = dotf(w12, halo)

    acc1, y0, y2 = taps(w10, w11, w12, xt, z0[:, 1:2], z2[:, 2:3])
    h1 = affine_relu(acc1, s1_ref, t1_ref)                         # (C, TL) f32

    # h1 at columns a-1 and b (the +-1 halo conv2 needs).  At the global
    # sequence ends these become the second ReflectionPad1d(1) values
    # h1[-1] = h1[1] and h1[L] = h1[L-2].  NOTE: the zero-filler halo columns
    # (x[a-2] on the first tile, x[b+1] on the last) are only consumed by the
    # branch the jnp.where below discards -- keep that invariant when
    # refactoring.
    h1_lo = affine_relu(z0[:, 0:1] + z1[:, 1:2] + y2[:, 0:1], s1_ref, t1_ref)
    h1_hi = affine_relu(y0[:, tl - 1:tl] + z1[:, 2:3] + z2[:, 3:4],
                        s1_ref, t1_ref)
    h1_lo = jnp.where(l == 0, h1[:, 1:2], h1_lo)
    h1_hi = jnp.where(l == n_l - 1, h1[:, tl - 2:tl - 1], h1_hi)

    # Dropout(0.5) is the identity at inference time.
    # TODO(synk): training-mode dropout (stateful PRNG mask) intentionally omitted.

    # ---------------- Conv2 + BN2 + ReLU ---------------- #
    h1c = h1.astype(xt.dtype)          # stays in registers; no VMEM round trip
    lo2 = dotf(w20, h1_lo.astype(xt.dtype))
    hi2 = dotf(w22, h1_hi.astype(xt.dtype))
    acc2, _, _ = taps(w20, w21, w22, h1c, lo2, hi2)
    h2 = affine_relu(acc2, s2_ref, t2_ref)

    # Residual add in f32; store in the output dtype (bf16 on the bf16 path).
    o_ref[0] = (xt.astype(jnp.float32) + h2).astype(o_ref.dtype)


# --------------------------------------------------------------------------- #
# Wrapper helpers
# --------------------------------------------------------------------------- #
def _fold_conv_bn(w_ock, b, gamma, beta, mean, var, eps):
    """Fold eval-mode BatchNorm (+ conv bias) into a per-channel affine and
    repack the conv weight as per-tap (C_out, C_in) matrices."""
    scale = gamma / jnp.sqrt(var + eps)                 # (C,)
    shift = beta - mean * scale + b * scale             # conv bias folded in
    w_koc = jnp.transpose(w_ock, (2, 0, 1))             # (3, C_out, C_in)
    return (w_koc.astype(jnp.float32),
            scale.reshape(-1, 1).astype(jnp.float32),
            shift.reshape(-1, 1).astype(jnp.float32))


def _build_halo(x_ncl, tl):
    """Per-tile halo columns [a-2, a-1, b, b+1] (conv-1 reflection at the ends;
    zero filler where a column is never consumed)."""
    n, c, length = x_ncl.shape
    n_l = length // tl
    zero = jnp.zeros((n, c, 1), x_ncl.dtype)
    # Padded coords: column j corresponds to original column j - 2.
    xp = jnp.concatenate(
        [zero, x_ncl[:, :, 1:2], x_ncl,
         x_ncl[:, :, length - 2:length - 1], zero], axis=2)      # (N, C, L + 4)
    starts = jnp.arange(n_l) * tl
    idx = jnp.concatenate(
        [starts[:, None] + jnp.arange(2)[None, :],               # cols a-2, a-1
         starts[:, None] + tl + 2 + jnp.arange(2)[None, :]],     # cols b, b+1
        axis=1)                                                  # (nL, 4)
    return jnp.transpose(xp[:, :, idx], (0, 2, 1, 3))            # (N, nL, C, 4)


def _choose_tile_l(length, target=512):
    """Largest multiple of 128 <= target that divides L (lane-dense tiles);
    falls back to one full-L tile (block dim == array dim is always legal)."""
    if length <= target:
        return length
    t = (target // 128) * 128
    while t >= 128:
        if length % t == 0:
            return t
        t -= 128
    return length


def _vmem_limit_bytes():
    """Generation-aware scoped-VMEM budget (half of physical, capped at 64MiB):
    ~32 MiB on v7x (64 MiB physical), ~64 MiB on v5e/v6e (128 MiB physical)."""
    cap = None
    try:
        cap = getattr(pltpu.get_tpu_info(), "vmem_capacity_bytes", None)
    except Exception:
        cap = None
    if not cap:
        cap = 128 * 1024 * 1024
    return int(min(cap // 2, 64 * 1024 * 1024))


# --------------------------------------------------------------------------- #
# Public wrapper
# --------------------------------------------------------------------------- #
def resnet_block_pallas(x_ncl, params, *, tile_l=None,
                        compute_dtype=jnp.float32, eps=1e-5):
    """x_ncl: (N, C, L) (PyTorch layout). Returns (N, C, L) in compute_dtype.

    Note: on the bf16 path the residual skip connection carries bf16 precision
    (inputs/activations/output are bf16; accumulation, affine and the residual
    add itself are done in f32)."""
    n, c, length = x_ncl.shape
    assert length >= 2, "ReflectionPad1d(1) needs L >= 2"

    tl = _choose_tile_l(length) if tile_l is None else tile_l
    assert length % tl == 0 and tl >= 2
    assert tl % 128 == 0 or tl == length, (
        "tile_l must be a multiple of 128 (lane dim) or the full length")
    n_l = length // tl

    vmem_limit = _vmem_limit_bytes()
    # Rough per-step working set: double-buffered x/out tiles + ~10 f32 (C, TL)
    # temporaries.  Guards the full-L fallback tile against a silent VMEM blowup.
    itemsize = jax.dtypes.canonicalize_dtype(compute_dtype).itemsize
    est = c * tl * (4 * itemsize + 10 * 4)
    assert est < vmem_limit, (
        f"tile (C={c}, TL={tl}) working set ~{est}B exceeds the VMEM budget "
        f"{vmem_limit}B; pass a smaller tile_l")

    w1, s1, t1 = _fold_conv_bn(params['conv1_w'], params['conv1_b'],
                               params['bn1_gamma'], params['bn1_beta'],
                               params['bn1_mean'], params['bn1_var'], eps)
    w2, s2, t2 = _fold_conv_bn(params['conv2_w'], params['conv2_b'],
                               params['bn2_gamma'], params['bn2_beta'],
                               params['bn2_mean'], params['bn2_var'], eps)

    x = x_ncl.astype(compute_dtype)                     # native (N, C, L) layout
    halo = _build_halo(x, tl)                           # (N, nL, C, 4)
    w1_in = w1.astype(compute_dtype)
    w2_in = w2.astype(compute_dtype)

    x_spec = pl.BlockSpec((1, c, tl), lambda ni, li: (ni, 0, li))
    halo_spec = pl.BlockSpec((1, 1, c, 4), lambda ni, li: (ni, li, 0, 0))
    out_spec = pl.BlockSpec((1, c, tl), lambda ni, li: (ni, 0, li))

    def const_spec(a, single_buffer):
        nd = a.ndim
        idx = lambda ni, li, _nd=nd: (0,) * _nd
        if single_buffer:
            # Constant-index blocks are never re-fetched: single-buffer them to
            # halve their VMEM footprint (matters for large C on v7x's 64 MiB).
            return pl.BlockSpec(a.shape, idx, pipeline_mode=pl.Buffered(1))
        return pl.BlockSpec(a.shape, idx)

    def run(single_buffer_consts):
        consts = (w1_in, s1, t1, w2_in, s2, t2)
        return pl.pallas_call(
            _resnet_block_kernel,
            out_shape=jax.ShapeDtypeStruct((n, c, length), compute_dtype),
            grid=(n, n_l),                  # both axes independent (v7x megacore)
            in_specs=[x_spec, halo_spec]
                     + [const_spec(a, single_buffer_consts) for a in consts],
            out_specs=out_spec,
            compiler_params=pltpu.CompilerParams(
                dimension_semantics=("parallel", "parallel"),
                vmem_limit_bytes=vmem_limit),
        )(x, halo, w1_in, s1, t1, w2_in, s2, t2)

    try:
        return run(True)
    except Exception:
        # pl.Buffered(1) pipeline_mode unsupported in this JAX version: fall
        # back to default (double-buffered) constant operands.
        return run(False)


# --------------------------------------------------------------------------- #
# Parameters + pure-JAX reference (module semantics, eval mode)
# --------------------------------------------------------------------------- #
def make_raw_params(key, dim):
    ks = jax.random.split(key, 12)

    def conv_bn(kw, kb, kg, kbe, km, kv):
        return dict(
            w=jax.random.normal(kw, (dim, dim, 3), jnp.float32) * 0.2,
            b=jax.random.normal(kb, (dim,), jnp.float32) * 0.1,
            gamma=1.0 + 0.1 * jax.random.normal(kg, (dim,), jnp.float32),
            beta=0.1 * jax.random.normal(kbe, (dim,), jnp.float32),
            mean=0.1 * jax.random.normal(km, (dim,), jnp.float32),
            var=jnp.abs(1.0 + 0.1 * jax.random.normal(kv, (dim,), jnp.float32)),
        )

    c1 = conv_bn(*ks[0:6])
    c2 = conv_bn(*ks[6:12])
    return dict(
        conv1_w=c1['w'], conv1_b=c1['b'],
        bn1_gamma=c1['gamma'], bn1_beta=c1['beta'],
        bn1_mean=c1['mean'], bn1_var=c1['var'],
        conv2_w=c2['w'], conv2_b=c2['b'],
        bn2_gamma=c2['gamma'], bn2_beta=c2['beta'],
        bn2_mean=c2['mean'], bn2_var=c2['var'],
    )


def resnet_block_ref(x_ncl, params, eps=1e-5):
    x = x_ncl.astype(jnp.float32)                       # (N, C, L)
    length = x.shape[2]

    def conv_bn_relu(inp, w, b, gamma, beta, mean, var):
        pad = jnp.concatenate(
            [inp[:, :, 1:2], inp, inp[:, :, length - 2:length - 1]], axis=2)
        acc = sum(jnp.einsum('ncl,oc->nol', pad[:, :, k:k + length], w[:, :, k])
                  for k in range(3)) + b[None, :, None]
        y = ((acc - mean[None, :, None]) / jnp.sqrt(var + eps)[None, :, None]
             * gamma[None, :, None] + beta[None, :, None])
        return jnp.maximum(y, 0.0)

    h = conv_bn_relu(x, params['conv1_w'], params['conv1_b'],
                     params['bn1_gamma'], params['bn1_beta'],
                     params['bn1_mean'], params['bn1_var'])
    h = conv_bn_relu(h, params['conv2_w'], params['conv2_b'],
                     params['bn2_gamma'], params['bn2_beta'],
                     params['bn2_mean'], params['bn2_var'])
    return x + h


if __name__ == "__main__":
    key = jax.random.PRNGKey(0)
    k_x, k_p = jax.random.split(key)

    batch, dim, length = 2, 4, 384
    x = jax.random.normal(k_x, (batch, dim, length), jnp.float32)   # (N, C, L)
    params = make_raw_params(k_p, dim)

    ref = jax.block_until_ready(resnet_block_ref(x, params))

    # Single-tile path (default tile = full L since 384 <= 512).
    out = jax.block_until_ready(resnet_block_pallas(x, params))
    assert out.shape == x.shape and out.dtype == jnp.float32
    assert jnp.allclose(out, ref, atol=1e-3, rtol=1e-3), "f32 single-tile mismatch"

    # Multi-tile path (3 lane tiles of 128: exercises first/interior/last halos).
    out_t = jax.block_until_ready(resnet_block_pallas(x, params, tile_l=128))
    assert jnp.allclose(out_t, ref, atol=1e-3, rtol=1e-3), "f32 tiled mismatch"

    # bf16 activations/weights/output, f32 accumulation + affine + residual.
    out_bf16 = jax.block_until_ready(
        resnet_block_pallas(x, params, tile_l=128, compute_dtype=jnp.bfloat16))
    assert out_bf16.dtype == jnp.bfloat16
    assert jnp.allclose(out_bf16.astype(jnp.float32), ref,
                        atol=8e-2, rtol=8e-2), "bf16 kernel mismatch"

    print("KERNEL_OK")
</pallas_src>

<mosaic_0001>
module attributes {stable_mosaic.version = 11 : i64} {
  func.func @_resnet_block_kernel(%arg0: i32, %arg1: i32, %arg2: memref<1x4x384xf32, #tpu.memory_space<vmem>>, %arg3: memref<1x1x4x4xf32, #tpu.memory_space<vmem>>, %arg4: memref<3x4x4xf32, #tpu.memory_space<vmem>>, %arg5: memref<4x1xf32, #tpu.memory_space<vmem>>, %arg6: memref<4x1xf32, #tpu.memory_space<vmem>>, %arg7: memref<3x4x4xf32, #tpu.memory_space<vmem>>, %arg8: memref<4x1xf32, #tpu.memory_space<vmem>>, %arg9: memref<4x1xf32, #tpu.memory_space<vmem>>, %arg10: memref<1x4x384xf32, #tpu.memory_space<vmem>>) attributes {dimension_semantics = [#tpu.dimension_semantics<parallel>, #tpu.dimension_semantics<parallel>], iteration_bounds = array<i64: 2, 1>, scalar_prefetch = 0 : i64, scratch_operands = 0 : i64, tpu.core_type = #tpu.core_type<tc>, window_params = [{transform_indices = @transform_0, window_bounds = array<i64: 1, 4, 384>}, {transform_indices = @transform_1, window_bounds = array<i64: 1, 1, 4, 4>}, {pipeline_mode = #tpu.pipeline_mode<synchronous>, transform_indices = @transform_2, window_bounds = array<i64: 3, 4, 4>}, {pipeline_mode = #tpu.pipeline_mode<synchronous>, transform_indices = @transform_3, window_bounds = array<i64: 4, 1>}, {pipeline_mode = #tpu.pipeline_mode<synchronous>, transform_indices = @transform_4, window_bounds = array<i64: 4, 1>}, {pipeline_mode = #tpu.pipeline_mode<synchronous>, transform_indices = @transform_5, window_bounds = array<i64: 3, 4, 4>}, {pipeline_mode = #tpu.pipeline_mode<synchronous>, transform_indices = @transform_6, window_bounds = array<i64: 4, 1>}, {pipeline_mode = #tpu.pipeline_mode<synchronous>, transform_indices = @transform_7, window_bounds = array<i64: 4, 1>}, {transform_indices = @transform_8, window_bounds = array<i64: 1, 4, 384>}]} {
    %c0 = arith.constant 0 : index
    %c0_0 = arith.constant 0 : index
    %c0_1 = arith.constant 0 : index
    %0 = vector.load %arg2[%c0, %c0_0, %c0_1] : memref<1x4x384xf32, #tpu.memory_space<vmem>>, vector<1x4x384xf32>
    %1 = vector.shape_cast %0 : vector<1x4x384xf32> to vector<4x384xf32>
    %c0_2 = arith.constant 0 : index
    %c0_3 = arith.constant 0 : index
    %c0_4 = arith.constant 0 : index
    %c0_5 = arith.constant 0 : index
    %2 = vector.load %arg3[%c0_2, %c0_3, %c0_4, %c0_5] : memref<1x1x4x4xf32, #tpu.memory_space<vmem>>, vector<1x1x4x4xf32>
    %3 = vector.shape_cast %2 : vector<1x1x4x4xf32> to vector<4x4xf32>
    %c0_6 = arith.constant 0 : index
    %c0_7 = arith.constant 0 : index
    %c0_8 = arith.constant 0 : index
    %4 = vector.load %arg4[%c0_6, %c0_7, %c0_8] : memref<3x4x4xf32, #tpu.memory_space<vmem>>, vector<1x4x4xf32>
    %5 = vector.shape_cast %4 : vector<1x4x4xf32> to vector<4x4xf32>
    %c1 = arith.constant 1 : index
    %c0_9 = arith.constant 0 : index
    %c0_10 = arith.constant 0 : index
    %6 = vector.load %arg4[%c1, %c0_9, %c0_10] : memref<3x4x4xf32, #tpu.memory_space<vmem>>, vector<1x4x4xf32>
    %7 = vector.shape_cast %6 : vector<1x4x4xf32> to vector<4x4xf32>
    %c2 = arith.constant 2 : index
    %c0_11 = arith.constant 0 : index
    %c0_12 = arith.constant 0 : index
    %8 = vector.load %arg4[%c2, %c0_11, %c0_12] : memref<3x4x4xf32, #tpu.memory_space<vmem>>, vector<1x4x4xf32>
    %9 = vector.shape_cast %8 : vector<1x4x4xf32> to vector<4x4xf32>
    %c0_13 = arith.constant 0 : index
    %c0_14 = arith.constant 0 : index
    %c0_15 = arith.constant 0 : index
    %10 = vector.load %arg7[%c0_13, %c0_14, %c0_15] : memref<3x4x4xf32, #tpu.memory_space<vmem>>, vector<1x4x4xf32>
    %11 = vector.shape_cast %10 : vector<1x4x4xf32> to vector<4x4xf32>
    %c1_16 = arith.constant 1 : index
    %c0_17 = arith.constant 0 : index
    %c0_18 = arith.constant 0 : index
    %12 = vector.load %arg7[%c1_16, %c0_17, %c0_18] : memref<3x4x4xf32, #tpu.memory_space<vmem>>, vector<1x4x4xf32>
    %13 = vector.shape_cast %12 : vector<1x4x4xf32> to vector<4x4xf32>
    %c2_19 = arith.constant 2 : index
    %c0_20 = arith.constant 0 : index
    %c0_21 = arith.constant 0 : index
    %14 = vector.load %arg7[%c2_19, %c0_20, %c0_21] : memref<3x4x4xf32, #tpu.memory_space<vmem>>, vector<1x4x4xf32>
    %15 = vector.shape_cast %14 : vector<1x4x4xf32> to vector<4x4xf32>
    %cst = arith.constant dense<0.000000e+00> : vector<4x4xf32>
    %16 = tpu.matmul %5, %3, %cst {dimension_numbers = #tpu.dot_dimension_numbers<[1], [0], [0], [1], [0, 0, 1, 1], [], []>} : vector<4x4xf32>, vector<4x4xf32>, vector<4x4xf32> -> vector<4x4xf32>
    %cst_22 = arith.constant dense<0.000000e+00> : vector<4x4xf32>
    %17 = tpu.matmul %7, %3, %cst_22 {dimension_numbers = #tpu.dot_dimension_numbers<[1], [0], [0], [1], [0, 0, 1, 1], [], []>} : vector<4x4xf32>, vector<4x4xf32>, vector<4x4xf32> -> vector<4x4xf32>
    %cst_23 = arith.constant dense<0.000000e+00> : vector<4x4xf32>
    %18 = tpu.matmul %9, %3, %cst_23 {dimension_numbers = #tpu.dot_dimension_numbers<[1], [0], [0], [1], [0, 0, 1, 1], [], []>} : vector<4x4xf32>, vector<4x4xf32>, vector<4x4xf32> -> vector<4x4xf32>
    %19 = vector.extract_strided_slice %16 {offsets = [0, 1], sizes = [4, 1], strides = [1, 1]} : vector<4x4xf32> to vector<4x1xf32>
    %20 = vector.extract_strided_slice %18 {offsets = [0, 2], sizes = [4, 1], strides = [1, 1]} : vector<4x4xf32> to vector<4x1xf32>
    %cst_24 = arith.constant dense<0.000000e+00> : vector<4x384xf32>
    %21 = tpu.matmul %5, %1, %cst_24 {dimension_numbers = #tpu.dot_dimension_numbers<[1], [0], [0], [1], [0, 0, 1, 1], [], []>} : vector<4x4xf32>, vector<4x384xf32>, vector<4x384xf32> -> vector<4x384xf32>
    %cst_25 = arith.constant dense<0.000000e+00> : vector<4x384xf32>
    %22 = tpu.matmul %7, %1, %cst_25 {dimension_numbers = #tpu.dot_dimension_numbers<[1], [0], [0], [1], [0, 0, 1, 1], [], []>} : vector<4x4xf32>, vector<4x384xf32>, vector<4x384xf32> -> vector<4x384xf32>
    %cst_26 = arith.constant dense<0.000000e+00> : vector<4x384xf32>
    %23 = tpu.matmul %9, %1, %cst_26 {dimension_numbers = #tpu.dot_dimension_numbers<[1], [0], [0], [1], [0, 0, 1, 1], [], []>} : vector<4x4xf32>, vector<4x384xf32>, vector<4x384xf32> -> vector<4x384xf32>
    %24 = vector.extract_strided_slice %21 {offsets = [0, 0], sizes = [4, 383], strides = [1, 1]} : vector<4x384xf32> to vector<4x383xf32>
    %25 = tpu.concatenate %19, %24 in 1 : vector<4x1xf32>, vector<4x383xf32> -> vector<4x384xf32>
    %26 = arith.addf %25, %22 : vector<4x384xf32>
    %27 = vector.extract_strided_slice %23 {offsets = [0, 1], sizes = [4, 383], strides = [1, 1]} : vector<4x384xf32> to vector<4x383xf32>
    %28 = tpu.concatenate %27, %20 in 1 : vector<4x383xf32>, vector<4x1xf32> -> vector<4x384xf32>
    %29 = arith.addf %26, %28 : vector<4x384xf32>
    %c0_27 = arith.constant 0 : index
    %c0_28 = arith.constant 0 : index
    %30 = vector.load %arg5[%c0_27, %c0_28] : memref<4x1xf32, #tpu.memory_space<vmem>>, vector<4x1xf32>
    %31 = vector.broadcast %30 : vector<4x1xf32> to vector<4x384xf32>
    %32 = arith.mulf %29, %31 : vector<4x384xf32>
    %c0_29 = arith.constant 0 : index
    %c0_30 = arith.constant 0 : index
    %33 = vector.load %arg6[%c0_29, %c0_30] : memref<4x1xf32, #tpu.memory_space<vmem>>, vector<4x1xf32>
    %34 = vector.broadcast %33 : vector<4x1xf32> to vector<4x384xf32>
    %35 = arith.addf %32, %34 : vector<4x384xf32>
    %cst_31 = arith.constant 0.000000e+00 : f32
    %36 = vector.broadcast %cst_31 : f32 to vector<4x384xf32>
    %37 = arith.maximumf %35, %36 : vector<4x384xf32>
    %38 = vector.extract_strided_slice %16 {offsets = [0, 0], sizes = [4, 1], strides = [1, 1]} : vector<4x4xf32> to vector<4x1xf32>
    %39 = vector.extract_strided_slice %17 {offsets = [0, 1], sizes = [4, 1], strides = [1, 1]} : vector<4x4xf32> to vector<4x1xf32>
    %40 = arith.addf %38, %39 : vector<4x1xf32>
    %41 = vector.extract_strided_slice %23 {offsets = [0, 0], sizes = [4, 1], strides = [1, 1]} : vector<4x384xf32> to vector<4x1xf32>
    %42 = arith.addf %40, %41 : vector<4x1xf32>
    %c0_32 = arith.constant 0 : index
    %c0_33 = arith.constant 0 : index
    %43 = vector.load %arg5[%c0_32, %c0_33] : memref<4x1xf32, #tpu.memory_space<vmem>>, vector<4x1xf32>
    %44 = arith.mulf %42, %43 : vector<4x1xf32>
    %c0_34 = arith.constant 0 : index
    %c0_35 = arith.constant 0 : index
    %45 = vector.load %arg6[%c0_34, %c0_35] : memref<4x1xf32, #tpu.memory_space<vmem>>, vector<4x1xf32>
    %46 = arith.addf %44, %45 : vector<4x1xf32>
    %cst_36 = arith.constant 0.000000e+00 : f32
    %47 = vector.broadcast %cst_36 : f32 to vector<4x1xf32>
    %48 = arith.maximumf %46, %47 : vector<4x1xf32>
    %49 = vector.extract_strided_slice %21 {offsets = [0, 383], sizes = [4, 1], strides = [1, 1]} : vector<4x384xf32> to vector<4x1xf32>
    %50 = vector.extract_strided_slice %17 {offsets = [0, 2], sizes = [4, 1], strides = [1, 1]} : vector<4x4xf32> to vector<4x1xf32>
    %51 = arith.addf %49, %50 : vector<4x1xf32>
    %52 = vector.extract_strided_slice %18 {offsets = [0, 3], sizes = [4, 1], strides = [1, 1]} : vector<4x4xf32> to vector<4x1xf32>
    %53 = arith.addf %51, %52 : vector<4x1xf32>
    %c0_37 = arith.constant 0 : index
    %c0_38 = arith.constant 0 : index
    %54 = vector.load %arg5[%c0_37, %c0_38] : memref<4x1xf32, #tpu.memory_space<vmem>>, vector<4x1xf32>
    %55 = arith.mulf %53, %54 : vector<4x1xf32>
    %c0_39 = arith.constant 0 : index
    %c0_40 = arith.constant 0 : index
    %56 = vector.load %arg6[%c0_39, %c0_40] : memref<4x1xf32, #tpu.memory_space<vmem>>, vector<4x1xf32>
    %57 = arith.addf %55, %56 : vector<4x1xf32>
    %cst_41 = arith.constant 0.000000e+00 : f32
    %58 = vector.broadcast %cst_41 : f32 to vector<4x1xf32>
    %59 = arith.maximumf %57, %58 : vector<4x1xf32>
    %c0_i32 = arith.constant 0 : i32
    %60 = arith.cmpi eq, %arg1, %c0_i32 : i32
    %61 = vector.extract_strided_slice %37 {offsets = [0, 1], sizes = [4, 1], strides = [1, 1]} : vector<4x384xf32> to vector<4x1xf32>
    %62 = arith.select %60, %61, %48 : vector<4x1xf32>
    %c0_i32_42 = arith.constant 0 : i32
    %63 = arith.cmpi eq, %arg1, %c0_i32_42 : i32
    %64 = vector.extract_strided_slice %37 {offsets = [0, 382], sizes = [4, 1], strides = [1, 1]} : vector<4x384xf32> to vector<4x1xf32>
    %65 = arith.select %63, %64, %59 : vector<4x1xf32>
    %cst_43 = arith.constant dense<0.000000e+00> : vector<4x1xf32>
    %66 = tpu.matmul %11, %62, %cst_43 {dimension_numbers = #tpu.dot_dimension_numbers<[1], [0], [0], [1], [0, 0, 1, 1], [], []>} : vector<4x4xf32>, vector<4x1xf32>, vector<4x1xf32> -> vector<4x1xf32>
    %cst_44 = arith.constant dense<0.000000e+00> : vector<4x1xf32>
    %67 = tpu.matmul %15, %65, %cst_44 {dimension_numbers = #tpu.dot_dimension_numbers<[1], [0], [0], [1], [0, 0, 1, 1], [], []>} : vector<4x4xf32>, vector<4x1xf32>, vector<4x1xf32> -> vector<4x1xf32>
    %cst_45 = arith.constant dense<0.000000e+00> : vector<4x384xf32>
    %68 = tpu.matmul %11, %37, %cst_45 {dimension_numbers = #tpu.dot_dimension_numbers<[1], [0], [0], [1], [0, 0, 1, 1], [], []>} : vector<4x4xf32>, vector<4x384xf32>, vector<4x384xf32> -> vector<4x384xf32>
    %cst_46 = arith.constant dense<0.000000e+00> : vector<4x384xf32>
    %69 = tpu.matmul %13, %37, %cst_46 {dimension_numbers = #tpu.dot_dimension_numbers<[1], [0], [0], [1], [0, 0, 1, 1], [], []>} : vector<4x4xf32>, vector<4x384xf32>, vector<4x384xf32> -> vector<4x384xf32>
    %cst_47 = arith.constant dense<0.000000e+00> : vector<4x384xf32>
    %70 = tpu.matmul %15, %37, %cst_47 {dimension_numbers = #tpu.dot_dimension_numbers<[1], [0], [0], [1], [0, 0, 1, 1], [], []>} : vector<4x4xf32>, vector<4x384xf32>, vector<4x384xf32> -> vector<4x384xf32>
    %71 = vector.extract_strided_slice %68 {offsets = [0, 0], sizes = [4, 383], strides = [1, 1]} : vector<4x384xf32> to vector<4x383xf32>
    %72 = tpu.concatenate %66, %71 in 1 : vector<4x1xf32>, vector<4x383xf32> -> vector<4x384xf32>
    %73 = arith.addf %72, %69 : vector<4x384xf32>
    %74 = vector.extract_strided_slice %70 {offsets = [0, 1], sizes = [4, 383], strides = [1, 1]} : vector<4x384xf32> to vector<4x383xf32>
    %75 = tpu.concatenate %74, %67 in 1 : vector<4x383xf32>, vector<4x1xf32> -> vector<4x384xf32>
    %76 = arith.addf %73, %75 : vector<4x384xf32>
    %c0_48 = arith.constant 0 : index
    %c0_49 = arith.constant 0 : index
    %77 = vector.load %arg8[%c0_48, %c0_49] : memref<4x1xf32, #tpu.memory_space<vmem>>, vector<4x1xf32>
    %78 = vector.broadcast %77 : vector<4x1xf32> to vector<4x384xf32>
    %79 = arith.mulf %76, %78 : vector<4x384xf32>
    %c0_50 = arith.constant 0 : index
    %c0_51 = arith.constant 0 : index
    %80 = vector.load %arg9[%c0_50, %c0_51] : memref<4x1xf32, #tpu.memory_space<vmem>>, vector<4x1xf32>
    %81 = vector.broadcast %80 : vector<4x1xf32> to vector<4x384xf32>
    %82 = arith.addf %79, %81 : vector<4x384xf32>
    %cst_52 = arith.constant 0.000000e+00 : f32
    %83 = vector.broadcast %cst_52 : f32 to vector<4x384xf32>
    %84 = arith.maximumf %82, %83 : vector<4x384xf32>
    %85 = arith.addf %1, %84 : vector<4x384xf32>
    %c0_53 = arith.constant 0 : index
    %c0_54 = arith.constant 0 : index
    %c0_55 = arith.constant 0 : index
    %86 = vector.load %arg10[%c0_53, %c0_54, %c0_55] : memref<1x4x384xf32, #tpu.memory_space<vmem>>, vector<1x4x384xf32>
    %87 = vector.shape_cast %86 : vector<1x4x384xf32> to vector<4x384xf32>
    %88 = vector.shape_cast %85 : vector<4x384xf32> to vector<1x4x384xf32>
    tpu.vector_store %arg10[%c0_53, %c0_54, %c0_55], %88 {strides = array<i32>} : memref<1x4x384xf32, #tpu.memory_space<vmem>>, vector<1x4x384xf32>,
    return
  }
  func.func @transform_0(%arg0: i32, %arg1: i32) -> (i32, i32, i32) {
    %c0_i32 = arith.constant 0 : i32
    %c0_i32_0 = arith.constant 0 : i32
    return %arg0, %c0_i32, %arg1 : i32, i32, i32
  }
  func.func @transform_1(%arg0: i32, %arg1: i32) -> (i32, i32, i32, i32) {
    %c0_i32 = arith.constant 0 : i32
    %c0_i32_0 = arith.constant 0 : i32
    %c0_i32_1 = arith.constant 0 : i32
    return %arg0, %arg1, %c0_i32, %c0_i32_0 : i32, i32, i32, i32
  }
  func.func @transform_2(%arg0: i32, %arg1: i32) -> (i32, i32, i32) {
    %c0_i32 = arith.constant 0 : i32
    %c0_i32_0 = arith.constant 0 : i32
    %c0_i32_1 = arith.constant 0 : i32
    %c0_i32_2 = arith.constant 0 : i32
    return %c0_i32, %c0_i32_0, %c0_i32_1 : i32, i32, i32
  }
  func.func @transform_3(%arg0: i32, %arg1: i32) -> (i32, i32) {
    %c0_i32 = arith.constant 0 : i32
    %c0_i32_0 = arith.constant 0 : i32
    %c0_i32_1 = arith.constant 0 : i32
    return %c0_i32, %c0_i32_0 : i32, i32
  }
  func.func @transform_4(%arg0: i32, %arg1: i32) -> (i32, i32) {
    %c0_i32 = arith.constant 0 : i32
    %c0_i32_0 = arith.constant 0 : i32
    %c0_i32_1 = arith.constant 0 : i32
    return %c0_i32, %c0_i32_0 : i32, i32
  }
  func.func @transform_5(%arg0: i32, %arg1: i32) -> (i32, i32, i32) {
    %c0_i32 = arith.constant 0 : i32
    %c0_i32_0 = arith.constant 0 : i32
    %c0_i32_1 = arith.constant 0 : i32
    %c0_i32_2 = arith.constant 0 : i32
    return %c0_i32, %c0_i32_0, %c0_i32_1 : i32, i32, i32
  }
  func.func @transform_6(%arg0: i32, %arg1: i32) -> (i32, i32) {
    %c0_i32 = arith.constant 0 : i32
    %c0_i32_0 = arith.constant 0 : i32
    %c0_i32_1 = arith.constant 0 : i32
    return %c0_i32, %c0_i32_0 : i32, i32
  }
  func.func @transform_7(%arg0: i32, %arg1: i32) -> (i32, i32) {
    %c0_i32 = arith.constant 0 : i32
    %c0_i32_0 = arith.constant 0 : i32
    %c0_i32_1 = arith.constant 0 : i32
    return %c0_i32, %c0_i32_0 : i32, i32
  }
  func.func @transform_8(%arg0: i32, %arg1: i32) -> (i32, i32, i32) {
    %c0_i32 = arith.constant 0 : i32
    %c0_i32_0 = arith.constant 0 : i32
    return %arg0, %c0_i32, %arg1 : i32, i32, i32
  }
}

module attributes {stable_mosaic.version = 11 : i64} {
  func.func @_resnet_block_kernel(%arg0: i32, %arg1: i32, %arg2: memref<1x4x384xf32, #tpu.memory_space<vmem>>, %arg3: memref<1x1x4x4xf32, #tpu.memory_space<vmem>>, %arg4: memref<3x4x4xf32, #tpu.memory_space<vmem>>, %arg5: memref<4x1xf32, #tpu.memory_space<vmem>>, %arg6: memref<4x1xf32, #tpu.memory_space<vmem>>, %arg7: memref<3x4x4xf32, #tpu.memory_space<vmem>>, %arg8: memref<4x1xf32, #tpu.memory_space<vmem>>, %arg9: memref<4x1xf32, #tpu.memory_space<vmem>>, %arg10: memref<1x4x384xf32, #tpu.memory_space<vmem>>) attributes {dimension_semantics = [#tpu.dimension_semantics<parallel>, #tpu.dimension_semantics<parallel>], iteration_bounds = array<i64: 2, 1>, scalar_prefetch = 0 : i64, scratch_operands = 0 : i64, tpu.core_type = #tpu.core_type<tc>, window_params = [{transform_indices = @transform_0, window_bounds = array<i64: 1, 4, 384>}, {transform_indices = @transform_1, window_bounds = array<i64: 1, 1, 4, 4>}, {pipeline_mode = #tpu.pipeline_mode<synchronous>, transform_indices = @transform_2, window_bounds = array<i64: 3, 4, 4>}, {pipeline_mode = #tpu.pipeline_mode<synchronous>, transform_indices = @transform_3, window_bounds = array<i64: 4, 1>}, {pipeline_mode = #tpu.pipeline_mode<synchronous>, transform_indices = @transform_4, window_bounds = array<i64: 4, 1>}, {pipeline_mode = #tpu.pipeline_mode<synchronous>, transform_indices = @transform_5, window_bounds = array<i64: 3, 4, 4>}, {pipeline_mode = #tpu.pipeline_mode<synchronous>, transform_indices = @transform_6, window_bounds = array<i64: 4, 1>}, {pipeline_mode = #tpu.pipeline_mode<synchronous>, transform_indices = @transform_7, window_bounds = array<i64: 4, 1>}, {transform_indices = @transform_8, window_bounds = array<i64: 1, 4, 384>}]} {
    %c0 = arith.constant 0 : index
    %c0_0 = arith.constant 0 : index
    %c0_1 = arith.constant 0 : index
    %0 = vector.load %arg2[%c0, %c0_0, %c0_1] : memref<1x4x384xf32, #tpu.memory_space<vmem>>, vector<1x4x384xf32>
    %1 = vector.shape_cast %0 : vector<1x4x384xf32> to vector<4x384xf32>
    %c0_2 = arith.constant 0 : index
    %c0_3 = arith.constant 0 : index
    %c0_4 = arith.constant 0 : index
    %c0_5 = arith.constant 0 : index
    %2 = vector.load %arg3[%c0_2, %c0_3, %c0_4, %c0_5] : memref<1x1x4x4xf32, #tpu.memory_space<vmem>>, vector<1x1x4x4xf32>
    %3 = vector.shape_cast %2 : vector<1x1x4x4xf32> to vector<4x4xf32>
    %c0_6 = arith.constant 0 : index
    %c0_7 = arith.constant 0 : index
    %c0_8 = arith.constant 0 : index
    %4 = vector.load %arg4[%c0_6, %c0_7, %c0_8] : memref<3x4x4xf32, #tpu.memory_space<vmem>>, vector<1x4x4xf32>
    %5 = vector.shape_cast %4 : vector<1x4x4xf32> to vector<4x4xf32>
    %c1 = arith.constant 1 : index
    %c0_9 = arith.constant 0 : index
    %c0_10 = arith.constant 0 : index
    %6 = vector.load %arg4[%c1, %c0_9, %c0_10] : memref<3x4x4xf32, #tpu.memory_space<vmem>>, vector<1x4x4xf32>
    %7 = vector.shape_cast %6 : vector<1x4x4xf32> to vector<4x4xf32>
    %c2 = arith.constant 2 : index
    %c0_11 = arith.constant 0 : index
    %c0_12 = arith.constant 0 : index
    %8 = vector.load %arg4[%c2, %c0_11, %c0_12] : memref<3x4x4xf32, #tpu.memory_space<vmem>>, vector<1x4x4xf32>
    %9 = vector.shape_cast %8 : vector<1x4x4xf32> to vector<4x4xf32>
    %c0_13 = arith.constant 0 : index
    %c0_14 = arith.constant 0 : index
    %c0_15 = arith.constant 0 : index
    %10 = vector.load %arg7[%c0_13, %c0_14, %c0_15] : memref<3x4x4xf32, #tpu.memory_space<vmem>>, vector<1x4x4xf32>
    %11 = vector.shape_cast %10 : vector<1x4x4xf32> to vector<4x4xf32>
    %c1_16 = arith.constant 1 : index
    %c0_17 = arith.constant 0 : index
    %c0_18 = arith.constant 0 : index
    %12 = vector.load %arg7[%c1_16, %c0_17, %c0_18] : memref<3x4x4xf32, #tpu.memory_space<vmem>>, vector<1x4x4xf32>
    %13 = vector.shape_cast %12 : vector<1x4x4xf32> to vector<4x4xf32>
    %c2_19 = arith.constant 2 : index
    %c0_20 = arith.constant 0 : index
    %c0_21 = arith.constant 0 : index
    %14 = vector.load %arg7[%c2_19, %c0_20, %c0_21] : memref<3x4x4xf32, #tpu.memory_space<vmem>>, vector<1x4x4xf32>
    %15 = vector.shape_cast %14 : vector<1x4x4xf32> to vector<4x4xf32>
    %cst = arith.constant dense<0.000000e+00> : vector<4x4xf32>
    %16 = tpu.matmul %5, %3, %cst {dimension_numbers = #tpu.dot_dimension_numbers<[1], [0], [0], [1], [0, 0, 1, 1], [], []>} : vector<4x4xf32>, vector<4x4xf32>, vector<4x4xf32> -> vector<4x4xf32>
    %cst_22 = arith.constant dense<0.000000e+00> : vector<4x4xf32>
    %17 = tpu.matmul %7, %3, %cst_22 {dimension_numbers = #tpu.dot_dimension_numbers<[1], [0], [0], [1], [0, 0, 1, 1], [], []>} : vector<4x4xf32>, vector<4x4xf32>, vector<4x4xf32> -> vector<4x4xf32>
    %cst_23 = arith.constant dense<0.000000e+00> : vector<4x4xf32>
    %18 = tpu.matmul %9, %3, %cst_23 {dimension_numbers = #tpu.dot_dimension_numbers<[1], [0], [0], [1], [0, 0, 1, 1], [], []>} : vector<4x4xf32>, vector<4x4xf32>, vector<4x4xf32> -> vector<4x4xf32>
    %19 = vector.extract_strided_slice %16 {offsets = [0, 1], sizes = [4, 1], strides = [1, 1]} : vector<4x4xf32> to vector<4x1xf32>
    %20 = vector.extract_strided_slice %18 {offsets = [0, 2], sizes = [4, 1], strides = [1, 1]} : vector<4x4xf32> to vector<4x1xf32>
    %cst_24 = arith.constant dense<0.000000e+00> : vector<4x384xf32>
    %21 = tpu.matmul %5, %1, %cst_24 {dimension_numbers = #tpu.dot_dimension_numbers<[1], [0], [0], [1], [0, 0, 1, 1], [], []>} : vector<4x4xf32>, vector<4x384xf32>, vector<4x384xf32> -> vector<4x384xf32>
    %cst_25 = arith.constant dense<0.000000e+00> : vector<4x384xf32>
    %22 = tpu.matmul %7, %1, %cst_25 {dimension_numbers = #tpu.dot_dimension_numbers<[1], [0], [0], [1], [0, 0, 1, 1], [], []>} : vector<4x4xf32>, vector<4x384xf32>, vector<4x384xf32> -> vector<4x384xf32>
    %cst_26 = arith.constant dense<0.000000e+00> : vector<4x384xf32>
    %23 = tpu.matmul %9, %1, %cst_26 {dimension_numbers = #tpu.dot_dimension_numbers<[1], [0], [0], [1], [0, 0, 1, 1], [], []>} : vector<4x4xf32>, vector<4x384xf32>, vector<4x384xf32> -> vector<4x384xf32>
    %24 = vector.extract_strided_slice %21 {offsets = [0, 0], sizes = [4, 383], strides = [1, 1]} : vector<4x384xf32> to vector<4x383xf32>
    %25 = tpu.concatenate %19, %24 in 1 : vector<4x1xf32>, vector<4x383xf32> -> vector<4x384xf32>
    %26 = arith.addf %25, %22 : vector<4x384xf32>
    %27 = vector.extract_strided_slice %23 {offsets = [0, 1], sizes = [4, 383], strides = [1, 1]} : vector<4x384xf32> to vector<4x383xf32>
    %28 = tpu.concatenate %27, %20 in 1 : vector<4x383xf32>, vector<4x1xf32> -> vector<4x384xf32>
    %29 = arith.addf %26, %28 : vector<4x384xf32>
    %c0_27 = arith.constant 0 : index
    %c0_28 = arith.constant 0 : index
    %30 = vector.load %arg5[%c0_27, %c0_28] : memref<4x1xf32, #tpu.memory_space<vmem>>, vector<4x1xf32>
    %31 = vector.broadcast %30 : vector<4x1xf32> to vector<4x384xf32>
    %32 = arith.mulf %29, %31 : vector<4x384xf32>
    %c0_29 = arith.constant 0 : index
    %c0_30 = arith.constant 0 : index
    %33 = vector.load %arg6[%c0_29, %c0_30] : memref<4x1xf32, #tpu.memory_space<vmem>>, vector<4x1xf32>
    %34 = vector.broadcast %33 : vector<4x1xf32> to vector<4x384xf32>
    %35 = arith.addf %32, %34 : vector<4x384xf32>
    %cst_31 = arith.constant 0.000000e+00 : f32
    %36 = vector.broadcast %cst_31 : f32 to vector<4x384xf32>
    %37 = arith.maximumf %35, %36 : vector<4x384xf32>
    %38 = vector.extract_strided_slice %16 {offsets = [0, 0], sizes = [4, 1], strides = [1, 1]} : vector<4x4xf32> to vector<4x1xf32>
    %39 = vector.extract_strided_slice %17 {offsets = [0, 1], sizes = [4, 1], strides = [1, 1]} : vector<4x4xf32> to vector<4x1xf32>
    %40 = arith.addf %38, %39 : vector<4x1xf32>
    %41 = vector.extract_strided_slice %23 {offsets = [0, 0], sizes = [4, 1], strides = [1, 1]} : vector<4x384xf32> to vector<4x1xf32>
    %42 = arith.addf %40, %41 : vector<4x1xf32>
    %c0_32 = arith.constant 0 : index
    %c0_33 = arith.constant 0 : index
    %43 = vector.load %arg5[%c0_32, %c0_33] : memref<4x1xf32, #tpu.memory_space<vmem>>, vector<4x1xf32>
    %44 = arith.mulf %42, %43 : vector<4x1xf32>
    %c0_34 = arith.constant 0 : index
    %c0_35 = arith.constant 0 : index
    %45 = vector.load %arg6[%c0_34, %c0_35] : memref<4x1xf32, #tpu.memory_space<vmem>>, vector<4x1xf32>
    %46 = arith.addf %44, %45 : vector<4x1xf32>
    %cst_36 = arith.constant 0.000000e+00 : f32
    %47 = vector.broadcast %cst_36 : f32 to vector<4x1xf32>
    %48 = arith.maximumf %46, %47 : vector<4x1xf32>
    %49 = vector.extract_strided_slice %21 {offsets = [0, 383], sizes = [4, 1], strides = [1, 1]} : vector<4x384xf32> to vector<4x1xf32>
    %50 = vector.extract_strided_slice %17 {offsets = [0, 2], sizes = [4, 1], strides = [1, 1]} : vector<4x4xf32> to vector<4x1xf32>
    %51 = arith.addf %49, %50 : vector<4x1xf32>
    %52 = vector.extract_strided_slice %18 {offsets = [0, 3], sizes = [4, 1], strides = [1, 1]} : vector<4x4xf32> to vector<4x1xf32>
    %53 = arith.addf %51, %52 : vector<4x1xf32>
    %c0_37 = arith.constant 0 : index
    %c0_38 = arith.constant 0 : index
    %54 = vector.load %arg5[%c0_37, %c0_38] : memref<4x1xf32, #tpu.memory_space<vmem>>, vector<4x1xf32>
    %55 = arith.mulf %53, %54 : vector<4x1xf32>
    %c0_39 = arith.constant 0 : index
    %c0_40 = arith.constant 0 : index
    %56 = vector.load %arg6[%c0_39, %c0_40] : memref<4x1xf32, #tpu.memory_space<vmem>>, vector<4x1xf32>
    %57 = arith.addf %55, %56 : vector<4x1xf32>
    %cst_41 = arith.constant 0.000000e+00 : f32
    %58 = vector.broadcast %cst_41 : f32 to vector<4x1xf32>
    %59 = arith.maximumf %57, %58 : vector<4x1xf32>
    %c0_i32 = arith.constant 0 : i32
    %60 = arith.cmpi eq, %arg1, %c0_i32 : i32
    %61 = vector.extract_strided_slice %37 {offsets = [0, 1], sizes = [4, 1], strides = [1, 1]} : vector<4x384xf32> to vector<4x1xf32>
    %62 = arith.select %60, %61, %48 : vector<4x1xf32>
    %c0_i32_42 = arith.constant 0 : i32
    %63 = arith.cmpi eq, %arg1, %c0_i32_42 : i32
    %64 = vector.extract_strided_slice %37 {offsets = [0, 382], sizes = [4, 1], strides = [1, 1]} : vector<4x384xf32> to vector<4x1xf32>
    %65 = arith.select %63, %64, %59 : vector<4x1xf32>
    %cst_43 = arith.constant dense<0.000000e+00> : vector<4x1xf32>
    %66 = tpu.matmul %11, %62, %cst_43 {dimension_numbers = #tpu.dot_dimension_numbers<[1], [0], [0], [1], [0, 0, 1, 1], [], []>} : vector<4x4xf32>, vector<4x1xf32>, vector<4x1xf32> -> vector<4x1xf32>
    %cst_44 = arith.constant dense<0.000000e+00> : vector<4x1xf32>
    %67 = tpu.matmul %15, %65, %cst_44 {dimension_numbers = #tpu.dot_dimension_numbers<[1], [0], [0], [1], [0, 0, 1, 1], [], []>} : vector<4x4xf32>, vector<4x1xf32>, vector<4x1xf32> -> vector<4x1xf32>
    %cst_45 = arith.constant dense<0.000000e+00> : vector<4x384xf32>
    %68 = tpu.matmul %11, %37, %cst_45 {dimension_numbers = #tpu.dot_dimension_numbers<[1], [0], [0], [1], [0, 0, 1, 1], [], []>} : vector<4x4xf32>, vector<4x384xf32>, vector<4x384xf32> -> vector<4x384xf32>
    %cst_46 = arith.constant dense<0.000000e+00> : vector<4x384xf32>
    %69 = tpu.matmul %13, %37, %cst_46 {dimension_numbers = #tpu.dot_dimension_numbers<[1], [0], [0], [1], [0, 0, 1, 1], [], []>} : vector<4x4xf32>, vector<4x384xf32>, vector<4x384xf32> -> vector<4x384xf32>
    %cst_47 = arith.constant dense<0.000000e+00> : vector<4x384xf32>
    %70 = tpu.matmul %15, %37, %cst_47 {dimension_numbers = #tpu.dot_dimension_numbers<[1], [0], [0], [1], [0, 0, 1, 1], [], []>} : vector<4x4xf32>, vector<4x384xf32>, vector<4x384xf32> -> vector<4x384xf32>
    %71 = vector.extract_strided_slice %68 {offsets = [0, 0], sizes = [4, 383], strides = [1, 1]} : vector<4x384xf32> to vector<4x383xf32>
    %72 = tpu.concatenate %66, %71 in 1 : vector<4x1xf32>, vector<4x383xf32> -> vector<4x384xf32>
    %73 = arith.addf %72, %69 : vector<4x384xf32>
    %74 = vector.extract_strided_slice %70 {offsets = [0, 1], sizes = [4, 383], strides = [1, 1]} : vector<4x384xf32> to vector<4x383xf32>
    %75 = tpu.concatenate %74, %67 in 1 : vector<4x383xf32>, vector<4x1xf32> -> vector<4x384xf32>
    %76 = arith.addf %73, %75 : vector<4x384xf32>
    %c0_48 = arith.constant 0 : index
    %c0_49 = arith.constant 0 : index
    %77 = vector.load %arg8[%c0_48, %c0_49] : memref<4x1xf32, #tpu.memory_space<vmem>>, vector<4x1xf32>
    %78 = vector.broadcast %77 : vector<4x1xf32> to vector<4x384xf32>
    %79 = arith.mulf %76, %78 : vector<4x384xf32>
    %c0_50 = arith.constant 0 : index
    %c0_51 = arith.constant 0 : index
    %80 = vector.load %arg9[%c0_50, %c0_51] : memref<4x1xf32, #tpu.memory_space<vmem>>, vector<4x1xf32>
    %81 = vector.broadcast %80 : vector<4x1xf32> to vector<4x384xf32>
    %82 = arith.addf %79, %81 : vector<4x384xf32>
    %cst_52 = arith.constant 0.000000e+00 : f32
    %83 = vector.broadcast %cst_52 : f32 to vector<4x384xf32>
    %84 = arith.maximumf %82, %83 : vector<4x384xf32>
    %85 = arith.addf %1, %84 : vector<4x384xf32>
    %c0_53 = arith.constant 0 : index
    %c0_54 = arith.constant 0 : index
    %c0_55 = arith.constant 0 : index
    %86 = vector.load %arg10[%c0_53, %c0_54, %c0_55] : memref<1x4x384xf32, #tpu.memory_space<vmem>>, vector<1x4x384xf32>
    %87 = vector.shape_cast %86 : vector<1x4x384xf32> to vector<4x384xf32>
    %88 = vector.shape_cast %85 : vector<4x384xf32> to vector<1x4x384xf32>
    tpu.vector_store %arg10[%c0_53, %c0_54, %c0_55], %88 {strides = array<i32>} : memref<1x4x384xf32, #tpu.memory_space<vmem>>, vector<1x4x384xf32>,
    return
  }
  func.func @transform_0(%arg0: i32, %arg1: i32) -> (i32, i32, i32) {
    %c0_i32 = arith.constant 0 : i32
    %c0_i32_0 = arith.constant 0 : i32
    return %arg0, %c0_i32, %arg1 : i32, i32, i32
  }
  func.func @transform_1(%arg0: i32, %arg1: i32) -> (i32, i32, i32, i32) {
    %c0_i32 = arith.constant 0 : i32
    %c0_i32_0 = arith.constant 0 : i32
    %c0_i32_1 = arith.constant 0 : i32
    return %arg0, %arg1, %c0_i32, %c0_i32_0 : i32, i32, i32, i32
  }
  func.func @transform_2(%arg0: i32, %arg1: i32) -> (i32, i32, i32) {
    %c0_i32 = arith.constant 0 : i32
    %c0_i32_0 = arith.constant 0 : i32
    %c0_i32_1 = arith.constant 0 : i32
    %c0_i32_2 = arith.constant 0 : i32
    return %c0_i32, %c0_i32_0, %c0_i32_1 : i32, i32, i32
  }
  func.func @transform_3(%arg0: i32, %arg1: i32) -> (i32, i32) {
    %c0_i32 = arith.constant 0 : i32
    %c0_i32_0 = arith.constant 0 : i32
    %c0_i32_1 = arith.constant 0 : i32
    return %c0_i32, %c0_i32_0 : i32, i32
  }
  func.func @transform_4(%arg0: i32, %arg1: i32) -> (i32, i32) {
    %c0_i32 = arith.constant 0 : i32
    %c0_i32_0 = arith.constant 0 : i32
    %c0_i32_1 = arith.constant 0 : i32
    return %c0_i32, %c0_i32_0 : i32, i32
  }
  func.func @transform_5(%arg0: i32, %arg1: i32) -> (i32, i32, i32) {
    %c0_i32 = arith.constant 0 : i32
    %c0_i32_0 = arith.constant 0 : i32
    %c0_i32_1 = arith.constant 0 : i32
    %c0_i32_2 = arith.constant 0 : i32
    return %c0_i32, %c0_i32_0, %c0_i32_1 : i32, i32, i32
  }
  func.func @transform_6(%arg0: i32, %arg1: i32) -> (i32, i32) {
    %c0_i32 = arith.constant 0 : i32
    %c0_i32_0 = arith.constant 0 : i32
    %c0_i32_1 = arith.constant 0 : i32
    return %c0_i32, %c0_i32_0 : i32, i32
  }
  func.func @transform_7(%arg0: i32, %arg1: i32) -> (i32, i32) {
    %c0_i32 = arith.constant 0 : i32
    %c0_i32_0 = arith.constant 0 : i32
    %c0_i32_1 = arith.constant 0 : i32
    return %c0_i32, %c0_i32_0 : i32, i32
  }
  func.func @transform_8(%arg0: i32, %arg1: i32) -> (i32, i32, i32) {
    %c0_i32 = arith.constant 0 : i32
    %c0_i32_0 = arith.constant 0 : i32
    return %arg0, %c0_i32, %arg1 : i32, i32, i32
  }
}

</mosaic_0001>

<bundles_post_ra>
// kernel: tpu_custom_call.1
= control target key start
LH: loop header
LB: loop body
LE: loop exit
PB: predicated region body
PF: predicated region fallthrough
CT: control target
= control target key end

     0   :  { %s1917_s0 = inlined_call_operand.hbm [shape: f32[2,4,384], index: 0, kind: input, shape index: {}]   ;;  %s1918_s1 = inlined_call_operand.vmem [shape: f32[2,1,4,4], index: 1, kind: input, shape index: {}]   ;;  %s1919_s2 = inlined_call_operand.hbm [shape: f32[3,4,4], index: 2, kind: input, shape index: {}]   ;;  %s1920_s3 = inlined_call_operand.vmem [shape: f32[4,1], index: 3, kind: input, shape index: {}]   ;;  %s1921_s4 = inlined_call_operand.vmem [shape: f32[4,1], index: 4, kind: input, shape index: {}]   ;;  %s1922_s5 = inlined_call_operand.hbm [shape: f32[3,4,4], index: 5, kind: input, shape index: {}]   ;;  %s1923_s6 = inlined_call_operand.vmem [shape: f32[4,1], index: 6, kind: input, shape index: {}]   ;;  %s1924_s7 = inlined_call_operand.vmem [shape: f32[4,1], index: 7, kind: input, shape index: {}]   ;;  %s1925_s8 = inlined_call_operand.hbm [shape: f32[2,4,384], index: 8, kind: output, shape index: {}]  }
   0x1   :  { %1927 = sst [smem:[#allocation13_spill]] %s1919_s2 }
   0x2   :  { %1928 = sst [smem:[#allocation14_spill]] %s1922_s5 }
   0x3   :  { %13 = vsyncpa [#allocation3], 0 }
   0x4   :  { %15 = vsyncpa [#allocation3 + $0x1], 0 }
   0x5   :  { %16 = vsyncpa [#allocation6], 0 }
   0x6   :  { %17 = vsyncpa [#allocation4], 0 }
   0x7   :  { %19 = vsyncpa [#allocation4 + $0x1], 0  ;;  %s1660_s27 = smov 0   ;;  %s1662_s28 = smov 0  }
   0x8   :  { %s1664_s29 = smov 0   ;;  %s1666_s30 = smov 0  }
   0x9   :  { %s1668_s9 = smov 0   ;;  %s1670_s10 = smov 0  }
   0xa LB: > { %s1272_s11 = sadd.s32 4294967295, %s1604_s10   ;;  %p1274_p0 = scmp.ge.s32.totalorder %s1604_s10, 1  ;;  %s1604_s10 = sphi %s1670_s10, %s25_s10   ;;  %s1600_s9 = sphi %s1668_s9, %s1943_s9   ;;  %s1596_s30 = sphi %s1666_s30, %s1942_s30   ;;  %s1592_s29 = sphi %s1664_s29, %s1941_s29   ;;  %s1588_s28 = sphi %s1662_s28, %s1940_s28   ;;  %s1584_s27 = sphi %s1660_s27, %s1939_s27  }
   0xb   : > { %p1694_p1 = scmp.eq.s32.totalorder %s1272_s11, 0  ;;  %p252_p2 = scmp.lt.s32.totalorder %s1604_s10, 3 }
   0xc   : > { %s1930_s2 = sld [smem:[#allocation13_spill]]  ;;  %s1606_s17 = smov [#allocation5]  }
   0xd   : > { %p1702_p3 = pnand %p1274_p0, %p252_p2  ;;  %s265_s18 = sshll.u32 %s1606_s17, 4  ;;  %s266_s18 = int_to_ptr.vmem [resolvable:$true] %s265_s18 }
   0xe   : > { %p1277_p6 = scmp.ge.s32.totalorder %s1604_s10, 2  ;;  %s1932_s5 = sld [smem:[#allocation14_spill]] }
   0xf   : > { %p1348_p4 = pneg %p1702_p3  ;;  %s1607_s22 = smov 64  }
  0x10   : > { %s1608_s23 = smov 4   ;;  %s1609_s24 = smov [#allocation7]  }
  0x11   : > { %p1349_p5 = pnand %p1348_p4, %p1694_p1  ;;  %s285_s25 = sshll.u32 %s1609_s24, 4  ;;  %s286_s25 = int_to_ptr.vmem [resolvable:$true] %s285_s25 }
  0x12   : > { %s263_s15 = sshll.u32 %s1930_s2, 4  ;;  %s1273_s26 = sadd.s32 4294967294, %s1604_s10   ;;  %s264_s15 = int_to_ptr.hbm [resolvable:$true] %s263_s15 }
  0x13   : > { %1351 = dma.hbm_to_vmem [thread:$0]  (!%p1349_p5), %s264_s15, 192, %s266_s18, [#allocation6], %s1607_s22, %s1607_s22, %s1608_s23  }
  0x14   : > { %s283_s21 = sshll.u32 %s1932_s5, 4  ;;  %s37_s13 = sadd.s32 1, %s1600_s9  ;;  %s284_s21 = int_to_ptr.hbm [resolvable:$true] %s283_s21 }
  0x15   : > { %1354 = dma.hbm_to_vmem [thread:$0]  (!%p1349_p5), %s284_s21, 192, %s286_s25, [#allocation6], %s1607_s22, %s1607_s22, %s1608_s23  }
  0x16   : > { %p39_p7 = scmp.ge.s32.totalorder %s37_s13, 2  ;;  %s46_s14 = sadd.s32 1, %s1592_s29 }
  0x17   : > { %p53_p8 = scmp.ne.s32.totalorder %s1592_s29, %s1588_s28  ;;  %p54_p9 = scmp.eq.s32.totalorder %s1604_s10, 0 }
  0x18   : > { %s1945_s13 = smov (%p39_p7, %s37_s13), 0  ;;  %p59_p11 = scmp.ne.s32.totalorder %s1588_s28, %s1584_s27 }
  0x19   : > { %1933 = sst [smem:[#allocation12_spill]] %s1945_s13  ;;  %p1722_p10 = por %p54_p9, %p53_p8 }
  0x1a   : > { %s41_s17 = ssub.s32 %s1600_s9, %s1945_s13  ;;  %p239_p12 = scmp.eq.s32.totalorder %s1272_s11, 1 }
  0x1b   : > { %p44_p13 = scmp.eq.s32.totalorder %s41_s17, 0  ;;  %p1734_p0 = por %p1694_p1, %p59_p11 }
  0x1c   : > { %p1738_p2 = por %p239_p12, %p53_p8  ;;  %p245_p4 = scmp.eq.s32.totalorder %s1273_s26, 1 }
  0x1d   : > { %s1743_s20 = scalar_select %p44_p13, %s1592_s29, %s46_s14  }
  0x1e   : > { %p1745_p5 = por %p245_p4, %p59_p11  ;;  %p1365_p7 = scmp.lt.s32.totalorder %s1604_s10, 2 }
  0x1f   : > { %s305_s22 = sand.u32 1, %s1592_s29   ;;  %s1333_s11 = smul.u32 12, %s1600_s9 }
  0x20   : > { %s1332_s23 = smul.u32 12, %s305_s22  ;;  %p1356_p8 = pnand %p1365_p7, %p1722_p10 }
  0x21   : > { %s316_s17 = scalar_lea.hbm %s1917_s0, %s1333_s11  ;;  %s306_s14 = scalar_lea.sflag [#allocation3], %s305_s22 }
  0x22   : > { %s318_s2 = sshll.u32 %s316_s17, 4  ;;  %s309_s5 = scalar_lea.vmem [#allocation2], %s1332_s23  ;;  %s319_s2 = int_to_ptr.hbm [resolvable:$true] %s318_s2 }
  0x23   : > { %s320_s26 = sshll.u32 %s309_s5, 4  ;;  %339 = sbr.rel (%p1702_p3) target bundleno = 730 (0x2da), region = 52  ;;  %s321_s26 = int_to_ptr.vmem [resolvable:$true] %s320_s26 }
  0x24   : > { %1358 = dma.hbm_to_vmem [thread:$0]  (!%p1356_p8), %s319_s2, 192, %s321_s26, %s306_s14  }
  0x25   : > { %s1760_s13 = sand.u32 (!%p1702_p3), 1, %s1588_s28  }
  0x26   : > { %s1334_s11 = smul.u32 (!%p1702_p3), 12, %s1760_s13  ;;  %s342_s15 = scalar_lea.sflag (!%p1702_p3), [#allocation3], %s1760_s13 }
  0x28   : > { %s345_s24 = scalar_lea.vmem [#allocation2], %s1334_s11 }
  0x29   : > { %1571 = dma.done.wait (%p1734_p0), %s342_s15, 192  }
  0x2a   : > { %1573 = vsyncadd (%p1734_p0), %s342_s15, 4294967104 }
  0x2b   : > { %1575 = dma.done.wait (%p1694_p1), [#allocation6], 384  }
  0x2c   : > { %1577 = vsyncadd (%p1694_p1), [#allocation6], 4294966912  ;;  %p397_p3 = scmp.lt.s32.totalorder %s1596_s30, 1  ;;  %vm422_vm0 = vcmask 1043456   ;;  %vm418_vm1 = vcmask 31744   ;;  %v1779_v2 = vld [vmem:[%s345_s24] sm:$0xff] }
  0x2d   : > { %v408_v1 = vld [vmem:[#allocation5] sm:$0xf]  ;;  %494 = vst [vmem:[#allocation1] ss:$2 sm:$0xff] %v1779_v2  ;;  %v410_v3 = vld [vmem:[#allocation5 + $0x4] sm:$0xf] }
  0x2e   : > { %s398_s2 = scalar_select %p397_p3, %s1596_s30, 1  ;;  %v412_v4 = vld [vmem:[#allocation5 + $0x8] sm:$0xf]  ;;  %v1786_v5 = vld [vmem:[%s345_s24 + $0x8] sm:$0xf]  ;;  %v1610_v16 = vmov 0  }
  0x2f   : > { %496 = vst [vmem:[#allocation1 + $0x10] ss:$2 sm:$0xff] %v1786_v5  ;;  %1427 = vset.pattern.permute.xlu0 %v1610_v16  ;;  %1426 = vset.pattern.permute.xlu2 %v1610_v16  ;;  %s1611_s12 = smov 127   ;;  %s1612_s18 = smov 125   ;;  %v765_v26 = vld [vmem:[%s1921_s4] sm:$0xf] }
  0x30   : > { %s1282_s5 = sshll.u32 %s398_s2, 2  ;;  %s1613_s25 = smov 1   ;;  %v756_v28 = vld [vmem:[%s1920_s3] sm:$0xf]  ;;  %vm723_vm2 = vcmask 7168   ;;  %vm742_vm3 = vcmask 1039360  }
  0x31   : > { %s403_s23 = scalar_lea.vmem %s1918_s1, %s1282_s5  ;;  %s1614_s24 = smov 2   ;;  %v413_v61 = vld [vmem:[#allocation7] sm:$0xf]  ;;  %v415_v62 = vld [vmem:[#allocation7 + $0x4] sm:$0xf] }
  0x32   : > { %v407_v0 = vld [vmem:[%s403_s23] sm:$0xf]  ;;  %v417_v63 = vld [vmem:[#allocation7 + $0x8] sm:$0xf]  ;;  %s1335_s23 = smul.u32 12, %s1596_s30  ;;  %s395_s30 = scalar_lea.vmem [#allocation8], %s1334_s11 }
  0x33   : > { %1283 = vmatpush.msk.msra.mxu0 %vm422_vm0, %v407_v0  ;;  %1285 = vmatpush.msk.msra.mxu1 %vm422_vm0, %v407_v0  ;;  %s1151_s17 = sshll.u32 %s395_s30, 4  ;;  %s1136_s14 = scalar_lea.sflag [#allocation4], %s1760_s13  ;;  %s1152_s17 = int_to_ptr.vmem [resolvable:$true] %s1151_s17 }
  0x34   : > { %1284 = vmatmul.msk.f32.vlgmr.msra.gmra.mxu0 %vm418_vm1, %v408_v1  ;;  %1287 = vmatpush.msk.msra.mxu2 %vm422_vm0, %v407_v0  ;;  %v497_v6 = vld.sshfl [vmem:[#allocation1] sm:$0xff pattern:$0x75316420]  ;;  %v498_v7 = vld.sshfl [vmem:[#allocation1 + $0x8] sm:$0xff pattern:$0x75316420] }
  0x35   : > { %1286 = vmatmul.msk.f32.vlgmr.msra.gmra.mxu1 %vm418_vm1, %v410_v3  ;;  %1288 = vmatmul.msk.f32.vlgmr.msra.gmra.mxu2 %vm418_vm1, %v412_v4  ;;  %566 = vst [vmem:[#allocation1] ss:$2 sm:$0xff] %v1779_v2  ;;  %s1538_s5 = scalar_lea.hbm %s1925_s8, 24 }
  0x36   : > { %1289 = vmatpush.msk.msra.mxu3 %vm422_vm0, %v497_v6  ;;  %1291 = vmatpush.msk.msrb.mxu0 %vm422_vm0, %v498_v7  ;;  %v499_v8 = vld.sshfl [vmem:[#allocation1 + $0x10] sm:$0xff pattern:$0x75316420] }
  0x37   : > { %1290 = vmatmul.msk.f32.vlgmr.msra.gmra.mxu3 %vm418_vm1, %v408_v1  ;;  %1293 = vmatpush.msk.msrb.mxu1 %vm422_vm0, %v499_v8  ;;  %568 = vst [vmem:[#allocation1 + $0x10] ss:$2 sm:$0xff] %v1786_v5 }
  0x3c   : > { %1292 = vmatmul.msk.f32.vlgmr.msrb.gmra.mxu0 %vm418_vm1, %v408_v1  ;;  %v569_v9 = vld.sshfl [vmem:[#allocation1] sm:$0xff pattern:$0x75316420]  ;;  %v570_v10 = vld.sshfl [vmem:[#allocation1 + $0x8] sm:$0xff pattern:$0x75316420] }
  0x3d   : > { %1294 = vmatmul.msk.f32.vlgmr.msrb.gmra.mxu1 %vm418_vm1, %v408_v1  ;;  %1295 = vmatpush.msk.msrb.mxu2 %vm422_vm0, %v569_v9  ;;  %638 = vst [vmem:[#allocation1] ss:$2 sm:$0xff] %v1779_v2 }
  0x3e   : > { %1297 = vmatpush.msk.msrb.mxu3 %vm422_vm0, %v570_v10  ;;  %v571_v11 = vld.sshfl [vmem:[#allocation1 + $0x10] sm:$0xff pattern:$0x75316420]  ;;  %1296 = vmatmul.msk.f32.vlgmr.msrb.gmra.mxu2 %vm418_vm1, %v410_v3  ;;  %v1105_v10 = vld [vmem:[%s1923_s6] sm:$0xf] }
  0x3f   : > { %1298 = vmatmul.msk.f32.vlgmr.msrb.gmra.mxu3 %vm418_vm1, %v410_v3  ;;  %640 = vst [vmem:[#allocation1 + $0x10] ss:$2 sm:$0xff] %v1786_v5  ;;  %1299 = vmatpush.msk.msra.mxu0 %vm422_vm0, %v571_v11 }
  0x44   : > { %1300 = vmatmul.msk.f32.vlgmr.msra.gmra.mxu0 %vm418_vm1, %v410_v3  ;;  %v641_v12 = vld.sshfl [vmem:[#allocation1] sm:$0xff pattern:$0x75316420]  ;;  %v642_v13 = vld.sshfl [vmem:[#allocation1 + $0x8] sm:$0xff pattern:$0x75316420] }
  0x45   : > { %1301 = vmatpush.msk.msra.mxu1 %vm422_vm0, %v641_v12  ;;  %1303 = vmatpush.msk.msra.mxu2 %vm422_vm0, %v642_v13 }
  0x46   : > { %1302 = vmatmul.msk.f32.vlgmr.msra.gmra.mxu1 %vm418_vm1, %v412_v4  ;;  %1304 = vmatmul.msk.f32.vlgmr.msra.gmra.mxu2 %vm418_vm1, %v412_v4  ;;  %v643_v14 = vld.sshfl [vmem:[#allocation1 + $0x10] sm:$0xff pattern:$0x75316420] }
  0x47   : > { %1305 = vmatpush.msk.msra.mxu3 %vm422_vm0, %v643_v14 }
  0x48   : > { %1306 = vmatmul.msk.f32.vlgmr.msra.gmra.mxu3 %vm418_vm1, %v412_v4 }
  0xb1   : > { %v443_v15 = vpop.f32.mrf.mxu0 }
  0xb2   : > { %711 = vrot.lane.b32.xlu1 %v443_v15, %s1611_s12  ;;  %v466_v17 = vpop.f32.mrf.mxu1 }
  0xb8   : > { %v489_v18 = vpop.f32.mrf.mxu2 }
  0xb9   : > { %v543_v19 = vpop.f32.mrf.mxu0  ;;  %749 = vrot.lane.b32.xlu2 %v489_v18, %s1612_s18  ;;  %v1114_v18 = vld [vmem:[%s1924_s7] sm:$0xf] }
  0xba   : > { %719 = vrot.lane.b32.xlu0 %v543_v19, %s1613_s25  ;;  %v523_v20 = vpop.f32.mrf.mxu3  ;;  %v563_v21 = vpop.f32.mrf.mxu1 }
  0xbb   : > { %717 = vrot.lane.b32.xlu1 %v523_v20, %s1613_s25 }
  0xc1   : > { %v595_v22 = vpop.f32.mrf.mxu2  ;;  %v635_v34 = vpop.f32.mrf.mxu0 }
  0xc2   : > { %721 = vrot.lane.b32.xlu0 %v563_v21, %s1613_s25  ;;  %v615_v23 = vpop.f32.mrf.mxu3 }
  0xc3   : > { %v667_v24 = vpop.f32.mrf.mxu1 }
  0xc9   : > { %v687_v25 = vpop.f32.mrf.mxu2 }
  0xca   : > { %736 = vrot.lane.b32.xlu0 %v667_v24, %s1611_s12  ;;  %738 = vrot.lane.b32.xlu1 %v687_v25, %s1611_s12 }
  0xcb   : > { %v707_v27 = vpop.f32.mrf.mxu3 }
  0xcc   : > { %740 = vrot.lane.b32.xlu2 %v707_v27, %s1611_s12 }
  0xd2   : > { %768 = vperm.xlu0 %1427, %v765_v26  }
  0xd4   : > { %759 = vperm.xlu2 %1426, %v756_v28  }
 0x113   : > { %v750_v29 = vpop.permute.xlu2 %749 }
 0x124   : > { %v712_v31 = vpop.permute.xlu1 %711 }
 0x126   : > { %v741_v33 = vpop.permute.xlu2 %740 }
 0x127   : > { %v752_v39 = vsel %vm742_vm3, %v741_v33, %v750_v29 }
 0x12c   : > { %v720_v30 = vpop.permute.xlu0 %719 }
 0x12d   : > { %v718_v36 = vpop.permute.xlu1 %717 }
 0x12e   : > { %v724_v40 = vsel %vm723_vm2, %v718_v36, %v720_v30  ;;  %v729_v41 = vsel %vm723_vm2, %v712_v31, %v718_v36  ;;  %v760_v43 = vpop.permute.xlu2 %759 }
 0x12f   : > { %v730_v44 = vadd.f32 %v729_v41, %v595_v22  ;;  %v731_v45 = vadd.f32 %v724_v40, %v615_v23 }
 0x134   : > { %v722_v32 = vpop.permute.xlu0 %721 }
 0x135   : > { %v725_v35 = vsel %vm723_vm2, %v720_v30, %v722_v32 }
 0x136   : > { %v732_v37 = vadd.f32 %v725_v35, %v635_v34 }
 0x138   : > { %v755_v42 = vadd.f32 %v752_v39, %v732_v37 }
 0x13a   : > { %v764_v47 = vmul.f32 %v760_v43, %v755_v42 }
 0x13c   : > { %v737_v38 = vpop.permute.xlu0 %736  ;;  %v739_v46 = vpop.permute.xlu1 %738 }
 0x13d   : > { %v743_v48 = vsel %vm742_vm3, %v737_v38, %v739_v46  ;;  %v744_v49 = vsel %vm742_vm3, %v739_v46, %v741_v33 }
 0x13e   : > { %v753_v50 = vadd.f32 %v743_v48, %v730_v44  ;;  %v754_v51 = vadd.f32 %v744_v49, %v731_v45 }
 0x140   : > { %v762_v54 = vmul.f32 %v760_v43, %v753_v50  ;;  %v763_v55 = vmul.f32 %v760_v43, %v754_v51 }
 0x144   : > { %v769_v52 = vpop.permute.xlu0 %768 }
 0x145   : > { %v773_v53 = vadd.f32 %v769_v52, %v764_v47  ;;  %v771_v57 = vadd.f32 %v769_v52, %v762_v54  ;;  %v772_v58 = vadd.f32 %v769_v52, %v763_v55 }
 0x147   : > { %v776_v56 = vmax.f32 %v773_v53, 0.0  ;;  %v774_v59 = vmax.f32 %v771_v57, 0.0  ;;  %v775_v60 = vmax.f32 %v772_v58, 0.0 }
 0x149   : > { %846 = vrot.lane.b32.xlu1 %v776_v56, %s1614_s24  ;;  %1313 = vmatpush.msk.msrb.mxu3 %vm422_vm0, %v775_v60 }
 0x14a   : > { %818 = vrot.lane.b32.xlu2 %v774_v59, %s1611_s12  ;;  %1311 = vmatpush.msk.msrb.mxu2 %vm422_vm0, %v774_v59 }
 0x14b   : > { %1321 = vmatpush.msk.msra.mxu3 %vm422_vm0, %v776_v56  ;;  %1312 = vmatmul.msk.f32.vlgmr.msrb.gmra.mxu2 %vm418_vm1, %v413_v61 }
 0x14c   : > { %1319 = vmatpush.msk.msra.mxu2 %vm422_vm0, %v775_v60  ;;  %1314 = vmatmul.msk.f32.vlgmr.msrb.gmra.mxu3 %vm418_vm1, %v413_v61 }
 0x14e   : > { %1327 = vmatpush.msk.msrb.mxu2 %vm422_vm0, %v776_v56 }
 0x153   : > { %1320 = vmatmul.msk.f32.vlgmr.msra.gmra.mxu2 %vm418_vm1, %v415_v62 }
 0x154   : > { %1322 = vmatmul.msk.f32.vlgmr.msra.gmra.mxu3 %vm418_vm1, %v415_v62 }
 0x15b   : > { %1328 = vmatmul.msk.f32.vlgmr.msrb.gmra.mxu2 %vm418_vm1, %v417_v63 }
 0x1a4   : > { %v819_v0 = vpop.permute.xlu2 %818 }
 0x1a5   : > { %1307 = vmatpush.msk.msrb.mxu0 %vm422_vm0, %v819_v0 }
 0x1a6   : > { %1308 = vmatmul.msk.f32.vlgmr.msrb.gmra.mxu0 %vm418_vm1, %v413_v61 }
 0x1a7   : > { %1315 = vmatpush.msk.msra.mxu0 %vm422_vm0, %v776_v56 }
 0x1a9   : > { %1323 = vmatpush.msk.msrb.mxu0 %vm422_vm0, %v774_v59 }
 0x1ae   : > { %1316 = vmatmul.msk.f32.vlgmr.msra.gmra.mxu0 %vm418_vm1, %v413_v61 }
 0x1b6   : > { %1324 = vmatmul.msk.f32.vlgmr.msrb.gmra.mxu0 %vm418_vm1, %v417_v63 }
 0x1bb   : > { %v847_v1 = vpop.permute.xlu1 %846 }
 0x1bc   : > { %1309 = vmatpush.msk.msrb.mxu1 %vm422_vm0, %v847_v1 }
 0x1bd   : > { %1310 = vmatmul.msk.f32.vlgmr.msrb.gmra.mxu1 %vm418_vm1, %v417_v63 }
 0x1be   : > { %1317 = vmatpush.msk.msra.mxu1 %vm422_vm0, %v774_v59 }
 0x1c0   : > { %1325 = vmatpush.msk.msrb.mxu1 %vm422_vm0, %v775_v60 }
 0x1c5   : > { %1318 = vmatmul.msk.f32.vlgmr.msra.gmra.mxu1 %vm418_vm1, %v415_v62 }
 0x1cd   : > { %1326 = vmatmul.msk.f32.vlgmr.msrb.gmra.mxu1 %vm418_vm1, %v417_v63 }
 0x1ce   : > { %v899_v4 = vpop.f32.mrf.mxu2 }
 0x1cf   : > { %v919_v3 = vpop.f32.mrf.mxu3  ;;  %1068 = vrot.lane.b32.xlu1 %v899_v4, %s1613_s25 }
 0x1d0   : > { %1070 = vrot.lane.b32.xlu2 %v919_v3, %s1613_s25 }
 0x1d6   : > { %v982_v6 = vpop.f32.mrf.mxu2 }
 0x1d7   : > { %v1002_v25 = vpop.f32.mrf.mxu3 }
 0x1de   : > { %v1062_v7 = vpop.f32.mrf.mxu2 }
 0x1df   : > { %1090 = vrot.lane.b32.xlu1 %v1062_v7, %s1611_s12 }
 0x223   : > { %v842_v8 = vpop.f32.mrf.mxu0 }
 0x22a   : > { %v1071_v20 = vpop.permute.xlu2 %1070 }
 0x22b   : > { %v939_v9 = vpop.f32.mrf.mxu0 }
 0x22c   : > { %1072 = vrot.lane.b32.xlu2 %v939_v9, %s1613_s25  ;;  %s1149_s25 = scalar_lea.hbm %s1925_s8, %s1335_s23 }
 0x22d   : > { %s1153_s26 = sshll.u32 %s1149_s25, 4  ;;  %s1154_s26 = int_to_ptr.hbm [resolvable:$true] %s1153_s26 }
 0x22e   : > { %s1532_s15 = sshra.s32 %s1154_s26, 4  ;;  %s1533_s15 = int_to_ptr.hbm [resolvable:$true] %s1532_s15 }
 0x22f   : > { %s1534_s24 = scalar_lea.hbm %s1533_s15, 12  ;;  %p1539_p11 = scmp.lt.s32.totalorder %s1533_s15, %s1925_s8 }
 0x230   : > { %p1535_p1 = scmp.ne.s32.totalorder %s1533_s15, %s1534_s24  ;;  %p1540_p12 = scmp.lt.s32.totalorder %s1538_s5, %s1534_s24 }
 0x232   : > { %p1536_p9 = pnand %p1535_p1, %p1738_p2  ;;  %p1541_p13 = por %p1540_p12, %p1539_p11 }
 0x233   : > { %v1022_v17 = vpop.f32.mrf.mxu0 }
 0x234   : > { %1108 = vperm.xlu2 %1426, %v1105_v10   ;;  %p1537_p10 = pneg %p1536_p9 }
 0x236   : > { %p1542_p0 = pnand %p1541_p13, %p1537_p10 }
 0x23a   : > { %v870_v11 = vpop.f32.mrf.mxu1 }
 0x23b   : > { %1098 = vrot.lane.b32.xlu1 %v870_v11, %s1611_s12 }
 0x241   : > { %v1069_v13 = vpop.permute.xlu1 %1068 }
 0x242   : > { %v962_v12 = vpop.f32.mrf.mxu1  ;;  %v1079_v14 = vsel %vm723_vm2, %v842_v8, %v1069_v13  ;;  %v1074_v24 = vsel %vm723_vm2, %v1069_v13, %v1071_v20 }
 0x243   : > { %v1080_v15 = vadd.f32 %v1079_v14, %v962_v12  ;;  %v1081_v30 = vadd.f32 %v1074_v24, %v982_v6 }
 0x24a   : > { %v1042_v16 = vpop.f32.mrf.mxu1 }
 0x24b   : > { %1088 = vrot.lane.b32.xlu0 %v1042_v16, %s1611_s12 }
 0x251   : > { %v1091_v19 = vpop.permute.xlu1 %1090 }
 0x253   : > { %1086 = vrot.lane.b32.xlu0 %v1022_v17, %s1611_s12 }
 0x25b   : > { %1117 = vperm.xlu0 %1427, %v1114_v18  }
 0x286   : > { %v1073_v22 = vpop.permute.xlu2 %1072 }
 0x287   : > { %v1075_v26 = vsel %vm723_vm2, %v1071_v20, %v1073_v22 }
 0x288   : > { %v1082_v31 = vadd.f32 %v1075_v26, %v1002_v25 }
 0x28e   : > { %v1109_v36 = vpop.permute.xlu2 %1108 }
 0x2ad   : > { %v1099_v23 = vpop.permute.xlu1 %1098 }
 0x2ae   : > { %v1101_v27 = vsel %vm742_vm3, %v1091_v19, %v1099_v23 }
 0x2af   : > { %v1104_v33 = vadd.f32 %v1101_v27, %v1082_v31 }
 0x2b1   : > { %v1113_v39 = vmul.f32 %v1109_v36, %v1104_v33 }
 0x2bd   : > { %v1089_v21 = vpop.permute.xlu0 %1088 }
 0x2be   : > { %v1093_v28 = vsel %vm742_vm3, %v1089_v21, %v1091_v19 }
 0x2bf   : > { %v1103_v34 = vadd.f32 %v1093_v28, %v1081_v30 }
 0x2c1   : > { %v1112_v38 = vmul.f32 %v1109_v36, %v1103_v34 }
 0x2c5   : > { %v1087_v29 = vpop.permute.xlu0 %1086 }
 0x2c6   : > { %v1092_v32 = vsel %vm742_vm3, %v1087_v29, %v1089_v21 }
 0x2c7   : > { %v1102_v35 = vadd.f32 %v1092_v32, %v1080_v15 }
 0x2c9   : > { %v1111_v37 = vmul.f32 %v1109_v36, %v1102_v35 }
 0x2cd   : > { %v1118_v40 = vpop.permute.xlu0 %1117 }
 0x2ce   : > { %v1120_v41 = vadd.f32 %v1118_v40, %v1111_v37  ;;  %v1121_v42 = vadd.f32 %v1118_v40, %v1112_v38  ;;  %v1122_v43 = vadd.f32 %v1118_v40, %v1113_v39 }
 0x2d0   : > { %v1124_v44 = vmax.f32 %v1121_v42, 0.0  ;;  %v1125_v45 = vmax.f32 %v1122_v43, 0.0  ;;  %v1123_v46 = vmax.f32 %v1120_v41, 0.0 }
 0x2d2   : > { %v1128_v47 = vrot.slane %v1124_v44, 4  ;;  %v1132_v48 = vadd.f32 %v1125_v45, %v1786_v5 }
 0x2d4   : > { %v1129_v49 = vsel %vm422_vm0, %v1123_v46, %v1128_v47  ;;  %1134 = vst [vmem:[%s395_s30 + $0x8] sm:$0xf] %v1132_v48 }
 0x2d5   : > { %v1131_v50 = vadd.f32 %v1129_v49, %v1779_v2 }
 0x2d7   : > { %1133 = vst [vmem:[%s395_s30] sm:$0xff] %v1131_v50 }
 0x2d8   : > { %1545 = shalt.err (!%p1542_p0)
}
 0x2d9   : > { %1346 = dma.vmem_to_hbm [thread:$0]  (%p1738_p2), %s1152_s17, 192, %s1154_s26, %s1136_s14  }
 0x2da PF: > { %s1165_s13 = sand.u32 1, %s1584_s27   ;;  %p1360_p4 = pnand %p1277_p6, %p1745_p5 }
 0x2db   : > { %s1166_s23 = scalar_lea.sflag [#allocation4], %s1165_s13 }
 0x2dc   : > { %p1361_p7 = pneg %p1360_p4 }
 0x2de   : > { %1579 = dma.done.wait (%p1361_p7), %s1166_s23, 192  }
 0x2df   : > { %1581 = vsyncadd (%p1361_p7), %s1166_s23, 4294967104  ;;  %s25_s10 = sadd.s32 1, %s1604_s10   ;;  %s1938_s19 = sld [smem:[#allocation12_spill]] }
 0x2e0   : > { %p22_p8 = scmp.ge.s32.totalorder %s25_s10, 4   ;;  %s1939_s27 = smov %s1588_s28 }
 0x2e1   : > { %s1940_s28 = smov %s1592_s29  ;;  %s1941_s29 = smov %s1743_s20 }
 0x2e2   : > { %s1942_s30 = smov %s1600_s9  ;;  %24 = sbr.rel (!%p22_p8) target bundleno = 10 (0xa), region = 115 }
 0x2e5   : > { %s1943_s9 = smov %s1938_s19 }
 0x2e7   :  { %1172 = vsyncpa [#allocation3], 1 }
 0x2e8   :  { %1174 = vsyncpa [#allocation3 + $0x1], 1 }
 0x2e9   :  { %1175 = vsyncpa [#allocation6], 1 }
 0x2ea   :  { %1176 = vsyncpa [#allocation4], 1 }
 0x2eb   :  { %1178 = vsyncpa [#allocation4 + $0x1], 1 }

// kernel: tpu_custom_call.1
= control target key start
LH: loop header
LB: loop body
LE: loop exit
PB: predicated region body
PF: predicated region fallthrough
CT: control target
= control target key end

     0   :  { %s1917_s0 = inlined_call_operand.hbm [shape: f32[2,4,384], index: 0, kind: input, shape index: {}]   ;;  %s1918_s1 = inlined_call_operand.vmem [shape: f32[2,1,4,4], index: 1, kind: input, shape index: {}]   ;;  %s1919_s2 = inlined_call_operand.hbm [shape: f32[3,4,4], index: 2, kind: input, shape index: {}]   ;;  %s1920_s3 = inlined_call_operand.vmem [shape: f32[4,1], index: 3, kind: input, shape index: {}]   ;;  %s1921_s4 = inlined_call_operand.vmem [shape: f32[4,1], index: 4, kind: input, shape index: {}]   ;;  %s1922_s5 = inlined_call_operand.hbm [shape: f32[3,4,4], index: 5, kind: input, shape index: {}]   ;;  %s1923_s6 = inlined_call_operand.vmem [shape: f32[4,1], index: 6, kind: input, shape index: {}]   ;;  %s1924_s7 = inlined_call_operand.vmem [shape: f32[4,1], index: 7, kind: input, shape index: {}]   ;;  %s1925_s8 = inlined_call_operand.hbm [shape: f32[2,4,384], index: 8, kind: output, shape index: {}]  }
   0x1   :  { %1927 = sst [smem:[#allocation13_spill]] %s1919_s2 }
   0x2   :  { %1928 = sst [smem:[#allocation14_spill]] %s1922_s5 }
   0x3   :  { %13 = vsyncpa [#allocation3], 0 }
   0x4   :  { %15 = vsyncpa [#allocation3 + $0x1], 0 }
   0x5   :  { %16 = vsyncpa [#allocation6], 0 }
   0x6   :  { %17 = vsyncpa [#allocation4], 0 }
   0x7   :  { %19 = vsyncpa [#allocation4 + $0x1], 0  ;;  %s1660_s27 = smov 0   ;;  %s1662_s28 = smov 0  }
   0x8   :  { %s1664_s29 = smov 0   ;;  %s1666_s30 = smov 0  }
   0x9   :  { %s1668_s9 = smov 0   ;;  %s1670_s10 = smov 0  }
   0xa LB: > { %s1272_s11 = sadd.s32 4294967295, %s1604_s10   ;;  %p1274_p0 = scmp.ge.s32.totalorder %s1604_s10, 1  ;;  %s1604_s10 = sphi %s1670_s10, %s25_s10   ;;  %s1600_s9 = sphi %s1668_s9, %s1943_s9   ;;  %s1596_s30 = sphi %s1666_s30, %s1942_s30   ;;  %s1592_s29 = sphi %s1664_s29, %s1941_s29   ;;  %s1588_s28 = sphi %s1662_s28, %s1940_s28   ;;  %s1584_s27 = sphi %s1660_s27, %s1939_s27  }
   0xb   : > { %p1694_p1 = scmp.eq.s32.totalorder %s1272_s11, 0  ;;  %p252_p2 = scmp.lt.s32.totalorder %s1604_s10, 3 }
   0xc   : > { %s1930_s2 = sld [smem:[#allocation13_spill]]  ;;  %s1606_s17 = smov [#allocation5]  }
   0xd   : > { %p1702_p3 = pnand %p1274_p0, %p252_p2  ;;  %s265_s18 = sshll.u32 %s1606_s17, 4  ;;  %s266_s18 = int_to_ptr.vmem [resolvable:$true] %s265_s18 }
   0xe   : > { %p1277_p6 = scmp.ge.s32.totalorder %s1604_s10, 2  ;;  %s1932_s5 = sld [smem:[#allocation14_spill]] }
   0xf   : > { %p1348_p4 = pneg %p1702_p3  ;;  %s1607_s22 = smov 64  }
  0x10   : > { %s1608_s23 = smov 4   ;;  %s1609_s24 = smov [#allocation7]  }
  0x11   : > { %p1349_p5 = pnand %p1348_p4, %p1694_p1  ;;  %s285_s25 = sshll.u32 %s1609_s24, 4  ;;  %s286_s25 = int_to_ptr.vmem [resolvable:$true] %s285_s25 }
  0x12   : > { %s263_s15 = sshll.u32 %s1930_s2, 4  ;;  %s1273_s26 = sadd.s32 4294967294, %s1604_s10   ;;  %s264_s15 = int_to_ptr.hbm [resolvable:$true] %s263_s15 }
  0x13   : > { %1351 = dma.hbm_to_vmem [thread:$0]  (!%p1349_p5), %s264_s15, 192, %s266_s18, [#allocation6], %s1607_s22, %s1607_s22, %s1608_s23  }
  0x14   : > { %s283_s21 = sshll.u32 %s1932_s5, 4  ;;  %s37_s13 = sadd.s32 1, %s1600_s9  ;;  %s284_s21 = int_to_ptr.hbm [resolvable:$true] %s283_s21 }
  0x15   : > { %1354 = dma.hbm_to_vmem [thread:$0]  (!%p1349_p5), %s284_s21, 192, %s286_s25, [#allocation6], %s1607_s22, %s1607_s22, %s1608_s23  }
  0x16   : > { %p39_p7 = scmp.ge.s32.totalorder %s37_s13, 2  ;;  %s46_s14 = sadd.s32 1, %s1592_s29 }
  0x17   : > { %p53_p8 = scmp.ne.s32.totalorder %s1592_s29, %s1588_s28  ;;  %p54_p9 = scmp.eq.s32.totalorder %s1604_s10, 0 }
  0x18   : > { %s1945_s13 = smov (%p39_p7, %s37_s13), 0  ;;  %p59_p11 = scmp.ne.s32.totalorder %s1588_s28, %s1584_s27 }
  0x19   : > { %1933 = sst [smem:[#allocation12_spill]] %s1945_s13  ;;  %p1722_p10 = por %p54_p9, %p53_p8 }
  0x1a   : > { %s41_s17 = ssub.s32 %s1600_s9, %s1945_s13  ;;  %p239_p12 = scmp.eq.s32.totalorder %s1272_s11, 1 }
  0x1b   : > { %p44_p13 = scmp.eq.s32.totalorder %s41_s17, 0  ;;  %p1734_p0 = por %p1694_p1, %p59_p11 }
  0x1c   : > { %p1738_p2 = por %p239_p12, %p53_p8  ;;  %p245_p4 = scmp.eq.s32.totalorder %s1273_s26, 1 }
  0x1d   : > { %s1743_s20 = scalar_select %p44_p13, %s1592_s29, %s46_s14  }
  0x1e   : > { %p1745_p5 = por %p245_p4, %p59_p11  ;;  %p1365_p7 = scmp.lt.s32.totalorder %s1604_s10, 2 }
  0x1f   : > { %s305_s22 = sand.u32 1, %s1592_s29   ;;  %s1333_s11 = smul.u32 12, %s1600_s9 }
  0x20   : > { %s1332_s23 = smul.u32 12, %s305_s22  ;;  %p1356_p8 = pnand %p1365_p7, %p1722_p10 }
  0x21   : > { %s316_s17 = scalar_lea.hbm %s1917_s0, %s1333_s11  ;;  %s306_s14 = scalar_lea.sflag [#allocation3], %s305_s22 }
  0x22   : > { %s318_s2 = sshll.u32 %s316_s17, 4  ;;  %s309_s5 = scalar_lea.vmem [#allocation2], %s1332_s23  ;;  %s319_s2 = int_to_ptr.hbm [resolvable:$true] %s318_s2 }
  0x23   : > { %s320_s26 = sshll.u32 %s309_s5, 4  ;;  %339 = sbr.rel (%p1702_p3) target bundleno = 730 (0x2da), region = 52  ;;  %s321_s26 = int_to_ptr.vmem [resolvable:$true] %s320_s26 }
  0x24   : > { %1358 = dma.hbm_to_vmem [thread:$0]  (!%p1356_p8), %s319_s2, 192, %s321_s26, %s306_s14  }
  0x25   : > { %s1760_s13 = sand.u32 (!%p1702_p3), 1, %s1588_s28  }
  0x26   : > { %s1334_s11 = smul.u32 (!%p1702_p3), 12, %s1760_s13  ;;  %s342_s15 = scalar_lea.sflag (!%p1702_p3), [#allocation3], %s1760_s13 }
  0x28   : > { %s345_s24 = scalar_lea.vmem [#allocation2], %s1334_s11 }
  0x29   : > { %1571 = dma.done.wait (%p1734_p0), %s342_s15, 192  }
  0x2a   : > { %1573 = vsyncadd (%p1734_p0), %s342_s15, 4294967104 }
  0x2b   : > { %1575 = dma.done.wait (%p1694_p1), [#allocation6], 384  }
  0x2c   : > { %1577 = vsyncadd (%p1694_p1), [#allocation6], 4294966912  ;;  %p397_p3 = scmp.lt.s32.totalorder %s1596_s30, 1  ;;  %vm422_vm0 = vcmask 1043456   ;;  %vm418_vm1 = vcmask 31744   ;;  %v1779_v2 = vld [vmem:[%s345_s24] sm:$0xff] }
  0x2d   : > { %v408_v1 = vld [vmem:[#allocation5] sm:$0xf]  ;;  %494 = vst [vmem:[#allocation1] ss:$2 sm:$0xff] %v1779_v2  ;;  %v410_v3 = vld [vmem:[#allocation5 + $0x4] sm:$0xf] }
  0x2e   : > { %s398_s2 = scalar_select %p397_p3, %s1596_s30, 1  ;;  %v412_v4 = vld [vmem:[#allocation5 + $0x8] sm:$0xf]  ;;  %v1786_v5 = vld [vmem:[%s345_s24 + $0x8] sm:$0xf]  ;;  %v1610_v16 = vmov 0  }
  0x2f   : > { %496 = vst [vmem:[#allocation1 + $0x10] ss:$2 sm:$0xff] %v1786_v5  ;;  %1427 = vset.pattern.permute.xlu0 %v1610_v16  ;;  %1426 = vset.pattern.permute.xlu2 %v1610_v16  ;;  %s1611_s12 = smov 127   ;;  %s1612_s18 = smov 125   ;;  %v765_v26 = vld [vmem:[%s1921_s4] sm:$0xf] }
  0x30   : > { %s1282_s5 = sshll.u32 %s398_s2, 2  ;;  %s1613_s25 = smov 1   ;;  %v756_v28 = vld [vmem:[%s1920_s3] sm:$0xf]  ;;  %vm723_vm2 = vcmask 7168   ;;  %vm742_vm3 = vcmask 1039360  }
  0x31   : > { %s403_s23 = scalar_lea.vmem %s1918_s1, %s1282_s5  ;;  %s1614_s24 = smov 2   ;;  %v413_v61 = vld [vmem:[#allocation7] sm:$0xf]  ;;  %v415_v62 = vld [vmem:[#allocation7 + $0x4] sm:$0xf] }
  0x32   : > { %v407_v0 = vld [vmem:[%s403_s23] sm:$0xf]  ;;  %v417_v63 = vld [vmem:[#allocation7 + $0x8] sm:$0xf]  ;;  %s1335_s23 = smul.u32 12, %s1596_s30  ;;  %s395_s30 = scalar_lea.vmem [#allocation8], %s1334_s11 }
  0x33   : > { %1283 = vmatpush.msk.msra.mxu0 %vm422_vm0, %v407_v0  ;;  %1285 = vmatpush.msk.msra.mxu1 %vm422_vm0, %v407_v0  ;;  %s1151_s17 = sshll.u32 %s395_s30, 4  ;;  %s1136_s14 = scalar_lea.sflag [#allocation4], %s1760_s13  ;;  %s1152_s17 = int_to_ptr.vmem [resolvable:$true] %s1151_s17 }
  0x34   : > { %1284 = vmatmul.msk.f32.vlgmr.msra.gmra.mxu0 %vm418_vm1, %v408_v1  ;;  %1287 = vmatpush.msk.msra.mxu2 %vm422_vm0, %v407_v0  ;;  %v497_v6 = vld.sshfl [vmem:[#allocation1] sm:$0xff pattern:$0x75316420]  ;;  %v498_v7 = vld.sshfl [vmem:[#allocation1 + $0x8] sm:$0xff pattern:$0x75316420] }
  0x35   : > { %1286 = vmatmul.msk.f32.vlgmr.msra.gmra.mxu1 %vm418_vm1, %v410_v3  ;;  %1288 = vmatmul.msk.f32.vlgmr.msra.gmra.mxu2 %vm418_vm1, %v412_v4  ;;  %566 = vst [vmem:[#allocation1] ss:$2 sm:$0xff] %v1779_v2  ;;  %s1538_s5 = scalar_lea.hbm %s1925_s8, 24 }
  0x36   : > { %1289 = vmatpush.msk.msra.mxu3 %vm422_vm0, %v497_v6  ;;  %1291 = vmatpush.msk.msrb.mxu0 %vm422_vm0, %v498_v7  ;;  %v499_v8 = vld.sshfl [vmem:[#allocation1 + $0x10] sm:$0xff pattern:$0x75316420] }
  0x37   : > { %1290 = vmatmul.msk.f32.vlgmr.msra.gmra.mxu3 %vm418_vm1, %v408_v1  ;;  %1293 = vmatpush.msk.msrb.mxu1 %vm422_vm0, %v499_v8  ;;  %568 = vst [vmem:[#allocation1 + $0x10] ss:$2 sm:$0xff] %v1786_v5 }
  0x3c   : > { %1292 = vmatmul.msk.f32.vlgmr.msrb.gmra.mxu0 %vm418_vm1, %v408_v1  ;;  %v569_v9 = vld.sshfl [vmem:[#allocation1] sm:$0xff pattern:$0x75316420]  ;;  %v570_v10 = vld.sshfl [vmem:[#allocation1 + $0x8] sm:$0xff pattern:$0x75316420] }
  0x3d   : > { %1294 = vmatmul.msk.f32.vlgmr.msrb.gmra.mxu1 %vm418_vm1, %v408_v1  ;;  %1295 = vmatpush.msk.msrb.mxu2 %vm422_vm0, %v569_v9  ;;  %638 = vst [vmem:[#allocation1] ss:$2 sm:$0xff] %v1779_v2 }
  0x3e   : > { %1297 = vmatpush.msk.msrb.mxu3 %vm422_vm0, %v570_v10  ;;  %v571_v11 = vld.sshfl [vmem:[#allocation1 + $0x10] sm:$0xff pattern:$0x75316420]  ;;  %1296 = vmatmul.msk.f32.vlgmr.msrb.gmra.mxu2 %vm418_vm1, %v410_v3  ;;  %v1105_v10 = vld [vmem:[%s1923_s6] sm:$0xf] }
  0x3f   : > { %1298 = vmatmul.msk.f32.vlgmr.msrb.gmra.mxu3 %vm418_vm1, %v410_v3  ;;  %640 = vst [vmem:[#allocation1 + $0x10] ss:$2 sm:$0xff] %v1786_v5  ;;  %1299 = vmatpush.msk.msra.mxu0 %vm422_vm0, %v571_v11 }
  0x44   : > { %1300 = vmatmul.msk.f32.vlgmr.msra.gmra.mxu0 %vm418_vm1, %v410_v3  ;;  %v641_v12 = vld.sshfl [vmem:[#allocation1] sm:$0xff pattern:$0x75316420]  ;;  %v642_v13 = vld.sshfl [vmem:[#allocation1 + $0x8] sm:$0xff pattern:$0x75316420] }
  0x45   : > { %1301 = vmatpush.msk.msra.mxu1 %vm422_vm0, %v641_v12  ;;  %1303 = vmatpush.msk.msra.mxu2 %vm422_vm0, %v642_v13 }
  0x46   : > { %1302 = vmatmul.msk.f32.vlgmr.msra.gmra.mxu1 %vm418_vm1, %v412_v4  ;;  %1304 = vmatmul.msk.f32.vlgmr.msra.gmra.mxu2 %vm418_vm1, %v412_v4  ;;  %v643_v14 = vld.sshfl [vmem:[#allocation1 + $0x10] sm:$0xff pattern:$0x75316420] }
  0x47   : > { %1305 = vmatpush.msk.msra.mxu3 %vm422_vm0, %v643_v14 }
  0x48   : > { %1306 = vmatmul.msk.f32.vlgmr.msra.gmra.mxu3 %vm418_vm1, %v412_v4 }
  0xb1   : > { %v443_v15 = vpop.f32.mrf.mxu0 }
  0xb2   : > { %711 = vrot.lane.b32.xlu1 %v443_v15, %s1611_s12  ;;  %v466_v17 = vpop.f32.mrf.mxu1 }
  0xb8   : > { %v489_v18 = vpop.f32.mrf.mxu2 }
  0xb9   : > { %v543_v19 = vpop.f32.mrf.mxu0  ;;  %749 = vrot.lane.b32.xlu2 %v489_v18, %s1612_s18  ;;  %v1114_v18 = vld [vmem:[%s1924_s7] sm:$0xf] }
  0xba   : > { %719 = vrot.lane.b32.xlu0 %v543_v19, %s1613_s25  ;;  %v523_v20 = vpop.f32.mrf.mxu3  ;;  %v563_v21 = vpop.f32.mrf.mxu1 }
  0xbb   : > { %717 = vrot.lane.b32.xlu1 %v523_v20, %s1613_s25 }
  0xc1   : > { %v595_v22 = vpop.f32.mrf.mxu2  ;;  %v635_v34 = vpop.f32.mrf.mxu0 }
  0xc2   : > { %721 = vrot.lane.b32.xlu0 %v563_v21, %s1613_s25  ;;  %v615_v23 = vpop.f32.mrf.mxu3 }
  0xc3   : > { %v667_v24 = vpop.f32.mrf.mxu1 }
  0xc9   : > { %v687_v25 = vpop.f32.mrf.mxu2 }
  0xca   : > { %736 = vrot.lane.b32.xlu0 %v667_v24, %s1611_s12  ;;  %738 = vrot.lane.b32.xlu1 %v687_v25, %s1611_s12 }
  0xcb   : > { %v707_v27 = vpop.f32.mrf.mxu3 }
  0xcc   : > { %740 = vrot.lane.b32.xlu2 %v707_v27, %s1611_s12 }
  0xd2   : > { %768 = vperm.xlu0 %1427, %v765_v26  }
  0xd4   : > { %759 = vperm.xlu2 %1426, %v756_v28  }
 0x113   : > { %v750_v29 = vpop.permute.xlu2 %749 }
 0x124   : > { %v712_v31 = vpop.permute.xlu1 %711 }
 0x126   : > { %v741_v33 = vpop.permute.xlu2 %740 }
 0x127   : > { %v752_v39 = vsel %vm742_vm3, %v741_v33, %v750_v29 }
 0x12c   : > { %v720_v30 = vpop.permute.xlu0 %719 }
 0x12d   : > { %v718_v36 = vpop.permute.xlu1 %717 }
 0x12e   : > { %v724_v40 = vsel %vm723_vm2, %v718_v36, %v720_v30  ;;  %v729_v41 = vsel %vm723_vm2, %v712_v31, %v718_v36  ;;  %v760_v43 = vpop.permute.xlu2 %759 }
 0x12f   : > { %v730_v44 = vadd.f32 %v729_v41, %v595_v22  ;;  %v731_v45 = vadd.f32 %v724_v40, %v615_v23 }
 0x134   : > { %v722_v32 = vpop.permute.xlu0 %721 }
 0x135   : > { %v725_v35 = vsel %vm723_vm2, %v720_v30, %v722_v32 }
 0x136   : > { %v732_v37 = vadd.f32 %v725_v35, %v635_v34 }
 0x138   : > { %v755_v42 = vadd.f32 %v752_v39, %v732_v37 }
 0x13a   : > { %v764_v47 = vmul.f32 %v760_v43, %v755_v42 }
 0x13c   : > { %v737_v38 = vpop.permute.xlu0 %736  ;;  %v739_v46 = vpop.permute.xlu1 %738 }
 0x13d   : > { %v743_v48 = vsel %vm742_vm3, %v737_v38, %v739_v46  ;;  %v744_v49 = vsel %vm742_vm3, %v739_v46, %v741_v33 }
 0x13e   : > { %v753_v50 = vadd.f32 %v743_v48, %v730_v44  ;;  %v754_v51 = vadd.f32 %v744_v49, %v731_v45 }
 0x140   : > { %v762_v54 = vmul.f32 %v760_v43, %v753_v50  ;;  %v763_v55 = vmul.f32 %v760_v43, %v754_v51 }
 0x144   : > { %v769_v52 = vpop.permute.xlu0 %768 }
 0x145   : > { %v773_v53 = vadd.f32 %v769_v52, %v764_v47  ;;  %v771_v57 = vadd.f32 %v769_v52, %v762_v54  ;;  %v772_v58 = vadd.f32 %v769_v52, %v763_v55 }
 0x147   : > { %v776_v56 = vmax.f32 %v773_v53, 0.0  ;;  %v774_v59 = vmax.f32 %v771_v57, 0.0  ;;  %v775_v60 = vmax.f32 %v772_v58, 0.0 }
 0x149   : > { %846 = vrot.lane.b32.xlu1 %v776_v56, %s1614_s24  ;;  %1313 = vmatpush.msk.msrb.mxu3 %vm422_vm0, %v775_v60 }
 0x14a   : > { %818 = vrot.lane.b32.xlu2 %v774_v59, %s1611_s12  ;;  %1311 = vmatpush.msk.msrb.mxu2 %vm422_vm0, %v774_v59 }
 0x14b   : > { %1321 = vmatpush.msk.msra.mxu3 %vm422_vm0, %v776_v56  ;;  %1312 = vmatmul.msk.f32.vlgmr.msrb.gmra.mxu2 %vm418_vm1, %v413_v61 }
 0x14c   : > { %1319 = vmatpush.msk.msra.mxu2 %vm422_vm0, %v775_v60  ;;  %1314 = vmatmul.msk.f32.vlgmr.msrb.gmra.mxu3 %vm418_vm1, %v413_v61 }
 0x14e   : > { %1327 = vmatpush.msk.msrb.mxu2 %vm422_vm0, %v776_v56 }
 0x153   : > { %1320 = vmatmul.msk.f32.vlgmr.msra.gmra.mxu2 %vm418_vm1, %v415_v62 }
 0x154   : > { %1322 = vmatmul.msk.f32.vlgmr.msra.gmra.mxu3 %vm418_vm1, %v415_v62 }
 0x15b   : > { %1328 = vmatmul.msk.f32.vlgmr.msrb.gmra.mxu2 %vm418_vm1, %v417_v63 }
 0x1a4   : > { %v819_v0 = vpop.permute.xlu2 %818 }
 0x1a5   : > { %1307 = vmatpush.msk.msrb.mxu0 %vm422_vm0, %v819_v0 }
 0x1a6   : > { %1308 = vmatmul.msk.f32.vlgmr.msrb.gmra.mxu0 %vm418_vm1, %v413_v61 }
 0x1a7   : > { %1315 = vmatpush.msk.msra.mxu0 %vm422_vm0, %v776_v56 }
 0x1a9   : > { %1323 = vmatpush.msk.msrb.mxu0 %vm422_vm0, %v774_v59 }
 0x1ae   : > { %1316 = vmatmul.msk.f32.vlgmr.msra.gmra.mxu0 %vm418_vm1, %v413_v61 }
 0x1b6   : > { %1324 = vmatmul.msk.f32.vlgmr.msrb.gmra.mxu0 %vm418_vm1, %v417_v63 }
 0x1bb   : > { %v847_v1 = vpop.permute.xlu1 %846 }
 0x1bc   : > { %1309 = vmatpush.msk.msrb.mxu1 %vm422_vm0, %v847_v1 }
 0x1bd   : > { %1310 = vmatmul.msk.f32.vlgmr.msrb.gmra.mxu1 %vm418_vm1, %v417_v63 }
 0x1be   : > { %1317 = vmatpush.msk.msra.mxu1 %vm422_vm0, %v774_v59 }
 0x1c0   : > { %1325 = vmatpush.msk.msrb.mxu1 %vm422_vm0, %v775_v60 }
 0x1c5   : > { %1318 = vmatmul.msk.f32.vlgmr.msra.gmra.mxu1 %vm418_vm1, %v415_v62 }
 0x1cd   : > { %1326 = vmatmul.msk.f32.vlgmr.msrb.gmra.mxu1 %vm418_vm1, %v417_v63 }
 0x1ce   : > { %v899_v4 = vpop.f32.mrf.mxu2 }
 0x1cf   : > { %v919_v3 = vpop.f32.mrf.mxu3  ;;  %1068 = vrot.lane.b32.xlu1 %v899_v4, %s1613_s25 }
 0x1d0   : > { %1070 = vrot.lane.b32.xlu2 %v919_v3, %s1613_s25 }
 0x1d6   : > { %v982_v6 = vpop.f32.mrf.mxu2 }
 0x1d7   : > { %v1002_v25 = vpop.f32.mrf.mxu3 }
 0x1de   : > { %v1062_v7 = vpop.f32.mrf.mxu2 }
 0x1df   : > { %1090 = vrot.lane.b32.xlu1 %v1062_v7, %s1611_s12 }
 0x223   : > { %v842_v8 = vpop.f32.mrf.mxu0 }
 0x22a   : > { %v1071_v20 = vpop.permute.xlu2 %1070 }
 0x22b   : > { %v939_v9 = vpop.f32.mrf.mxu0 }
 0x22c   : > { %1072 = vrot.lane.b32.xlu2 %v939_v9, %s1613_s25  ;;  %s1149_s25 = scalar_lea.hbm %s1925_s8, %s1335_s23 }
 0x22d   : > { %s1153_s26 = sshll.u32 %s1149_s25, 4  ;;  %s1154_s26 = int_to_ptr.hbm [resolvable:$true] %s1153_s26 }
 0x22e   : > { %s1532_s15 = sshra.s32 %s1154_s26, 4  ;;  %s1533_s15 = int_to_ptr.hbm [resolvable:$true] %s1532_s15 }
 0x22f   : > { %s1534_s24 = scalar_lea.hbm %s1533_s15, 12  ;;  %p1539_p11 = scmp.lt.s32.totalorder %s1533_s15, %s1925_s8 }
 0x230   : > { %p1535_p1 = scmp.ne.s32.totalorder %s1533_s15, %s1534_s24  ;;  %p1540_p12 = scmp.lt.s32.totalorder %s1538_s5, %s1534_s24 }
 0x232   : > { %p1536_p9 = pnand %p1535_p1, %p1738_p2  ;;  %p1541_p13 = por %p1540_p12, %p1539_p11 }
 0x233   : > { %v1022_v17 = vpop.f32.mrf.mxu0 }
 0x234   : > { %1108 = vperm.xlu2 %1426, %v1105_v10   ;;  %p1537_p10 = pneg %p1536_p9 }
 0x236   : > { %p1542_p0 = pnand %p1541_p13, %p1537_p10 }
 0x23a   : > { %v870_v11 = vpop.f32.mrf.mxu1 }
 0x23b   : > { %1098 = vrot.lane.b32.xlu1 %v870_v11, %s1611_s12 }
 0x241   : > { %v1069_v13 = vpop.permute.xlu1 %1068 }
 0x242   : > { %v962_v12 = vpop.f32.mrf.mxu1  ;;  %v1079_v14 = vsel %vm723_vm2, %v842_v8, %v1069_v13  ;;  %v1074_v24 = vsel %vm723_vm2, %v1069_v13, %v1071_v20 }
 0x243   : > { %v1080_v15 = vadd.f32 %v1079_v14, %v962_v12  ;;  %v1081_v30 = vadd.f32 %v1074_v24, %v982_v6 }
 0x24a   : > { %v1042_v16 = vpop.f32.mrf.mxu1 }
 0x24b   : > { %1088 = vrot.lane.b32.xlu0 %v1042_v16, %s1611_s12 }
 0x251   : > { %v1091_v19 = vpop.permute.xlu1 %1090 }
 0x253   : > { %1086 = vrot.lane.b32.xlu0 %v1022_v17, %s1611_s12 }
 0x25b   : > { %1117 = vperm.xlu0 %1427, %v1114_v18  }
 0x286   : > { %v1073_v22 = vpop.permute.xlu2 %1072 }
 0x287   : > { %v1075_v26 = vsel %vm723_vm2, %v1071_v20, %v1073_v22 }
 0x288   : > { %v1082_v31 = vadd.f32 %v1075_v26, %v1002_v25 }
 0x28e   : > { %v1109_v36 = vpop.permute.xlu2 %1108 }
 0x2ad   : > { %v1099_v23 = vpop.permute.xlu1 %1098 }
 0x2ae   : > { %v1101_v27 = vsel %vm742_vm3, %v1091_v19, %v1099_v23 }
 0x2af   : > { %v1104_v33 = vadd.f32 %v1101_v27, %v1082_v31 }
 0x2b1   : > { %v1113_v39 = vmul.f32 %v1109_v36, %v1104_v33 }
 0x2bd   : > { %v1089_v21 = vpop.permute.xlu0 %1088 }
 0x2be   : > { %v1093_v28 = vsel %vm742_vm3, %v1089_v21, %v1091_v19 }
 0x2bf   : > { %v1103_v34 = vadd.f32 %v1093_v28, %v1081_v30 }
 0x2c1   : > { %v1112_v38 = vmul.f32 %v1109_v36, %v1103_v34 }
 0x2c5   : > { %v1087_v29 = vpop.permute.xlu0 %1086 }
 0x2c6   : > { %v1092_v32 = vsel %vm742_vm3, %v1087_v29, %v1089_v21 }
 0x2c7   : > { %v1102_v35 = vadd.f32 %v1092_v32, %v1080_v15 }
 0x2c9   : > { %v1111_v37 = vmul.f32 %v1109_v36, %v1102_v35 }
 0x2cd   : > { %v1118_v40 = vpop.permute.xlu0 %1117 }
 0x2ce   : > { %v1120_v41 = vadd.f32 %v1118_v40, %v1111_v37  ;;  %v1121_v42 = vadd.f32 %v1118_v40, %v1112_v38  ;;  %v1122_v43 = vadd.f32 %v1118_v40, %v1113_v39 }
 0x2d0   : > { %v1124_v44 = vmax.f32 %v1121_v42, 0.0  ;;  %v1125_v45 = vmax.f32 %v1122_v43, 0.0  ;;  %v1123_v46 = vmax.f32 %v1120_v41, 0.0 }
 0x2d2   : > { %v1128_v47 = vrot.slane %v1124_v44, 4  ;;  %v1132_v48 = vadd.f32 %v1125_v45, %v1786_v5 }
 0x2d4   : > { %v1129_v49 = vsel %vm422_vm0, %v1123_v46, %v1128_v47  ;;  %1134 = vst [vmem:[%s395_s30 + $0x8] sm:$0xf] %v1132_v48 }
 0x2d5   : > { %v1131_v50 = vadd.f32 %v1129_v49, %v1779_v2 }
 0x2d7   : > { %1133 = vst [vmem:[%s395_s30] sm:$0xff] %v1131_v50 }
 0x2d8   : > { %1545 = shalt.err (!%p1542_p0)
}
 0x2d9   : > { %1346 = dma.vmem_to_hbm [thread:$0]  (%p1738_p2), %s1152_s17, 192, %s1154_s26, %s1136_s14  }
 0x2da PF: > { %s1165_s13 = sand.u32 1, %s1584_s27   ;;  %p1360_p4 = pnand %p1277_p6, %p1745_p5 }
 0x2db   : > { %s1166_s23 = scalar_lea.sflag [#allocation4], %s1165_s13 }
 0x2dc   : > { %p1361_p7 = pneg %p1360_p4 }
 0x2de   : > { %1579 = dma.done.wait (%p1361_p7), %s1166_s23, 192  }
 0x2df   : > { %1581 = vsyncadd (%p1361_p7), %s1166_s23, 4294967104  ;;  %s25_s10 = sadd.s32 1, %s1604_s10   ;;  %s1938_s19 = sld [smem:[#allocation12_spill]] }
 0x2e0   : > { %p22_p8 = scmp.ge.s32.totalorder %s25_s10, 4   ;;  %s1939_s27 = smov %s1588_s28 }
 0x2e1   : > { %s1940_s28 = smov %s1592_s29  ;;  %s1941_s29 = smov %s1743_s20 }
 0x2e2   : > { %s1942_s30 = smov %s1600_s9  ;;  %24 = sbr.rel (!%p22_p8) target bundleno = 10 (0xa), region = 115 }
 0x2e5   : > { %s1943_s9 = smov %s1938_s19 }
 0x2e7   :  { %1172 = vsyncpa [#allocation3], 1 }
 0x2e8   :  { %1174 = vsyncpa [#allocation3 + $0x1], 1 }
 0x2e9   :  { %1175 = vsyncpa [#allocation6], 1 }
 0x2ea   :  { %1176 = vsyncpa [#allocation4], 1 }
 0x2eb   :  { %1178 = vsyncpa [#allocation4 + $0x1], 1 }

</bundles_post_ra>
